<compile_context>
chip_gen: v5e
topology: v5e:2x2
jax: 0.10.0
libtpu: 0.0.40
codegen_flags: <defaults>
</compile_context>

<pallas_src>
import math

import jax
import jax.numpy as jnp
from jax.experimental import pallas as pl
from jax.experimental.pallas import tpu as pltpu

# ---- model config (small, consistent with TransformerBlock's __init__) ----
DIM = 32
N_HEADS = 4
HEAD_DIM = DIM // N_HEADS
SEQ = 8
BATCH = 2
EPS = 1e-6
MULTIPLE_OF = 256
_h = int(2 * (4 * DIM) / 3)
HIDDEN = MULTIPLE_OF * ((_h + MULTIPLE_OF - 1) // MULTIPLE_OF)  # = 256 for DIM=32


def _rmsnorm(v, w):
    # v: (N, D) f32, w: (1, D) f32
    ms = jnp.mean(v * v, axis=-1, keepdims=True)
    return v * jax.lax.rsqrt(ms + EPS) * w


def transformer_block_kernel(
    x_ref, cos_ref, sin_ref, mask_ref,
    wq_ref, wqr_ref, wk_ref, wkr_ref, wv_ref, wo_ref,
    w1_ref, w2_ref, w3_ref,
    attn_nw_ref, ffn_nw_ref,
    out_ref,
):
    x = x_ref[...]            # (B*S, D) f32
    cos = cos_ref[...]        # (B*S, HEAD_DIM) f32 (tiled over batch)
    sin = sin_ref[...]
    mask = mask_ref[...]      # (B*S, B*S) block-diagonal causal additive mask

    # ---- attention branch: h = x + sum_h (attn_h @ wo_h) ----
    xn = _rmsnorm(x, attn_nw_ref[...])
    xn_b = xn.astype(jnp.bfloat16)

    attn = jnp.zeros(x.shape, jnp.float32)
    for h in range(N_HEADS):  # static unrolled loop (N_HEADS = 4)
        # per-head projections via leading-axis weight views (no lane slicing)
        q0 = jnp.dot(xn_b, wq_ref[h], preferred_element_type=jnp.float32)
        qr = jnp.dot(xn_b, wqr_ref[h], preferred_element_type=jnp.float32)
        k0 = jnp.dot(xn_b, wk_ref[h], preferred_element_type=jnp.float32)
        kr = jnp.dot(xn_b, wkr_ref[h], preferred_element_type=jnp.float32)
        v = jnp.dot(xn_b, wv_ref[h], preferred_element_type=jnp.float32)

        # RoPE: rotate_half already folded into wqr/wkr; 1/sqrt(hd) folded in wq/wqr
        q = q0 * cos + qr * sin
        k = k0 * cos + kr * sin

        # scores over the flattened (B*S) axis; block-diag mask isolates batches
        s = jax.lax.dot_general(
            q.astype(jnp.bfloat16), k.astype(jnp.bfloat16),
            (((1,), (1,)), ((), ())),
            preferred_element_type=jnp.float32)          # (B*S, B*S)
        s = s + mask
        s = s - jnp.max(s, axis=-1, keepdims=True)
        p = jnp.exp(s)
        p = p * pl.reciprocal(jnp.sum(p, axis=-1, keepdims=True), approx=True)

        pv = jnp.dot(p.astype(jnp.bfloat16), v.astype(jnp.bfloat16),
                     preferred_element_type=jnp.float32)  # (B*S, HEAD_DIM)
        # accumulate through row-sliced wo (no lane-axis concat)
        attn = attn + jnp.dot(pv.astype(jnp.bfloat16), wo_ref[h],
                              preferred_element_type=jnp.float32)

    h_res = x + attn

    # ---- feed-forward branch: out = h + w2(silu(w1(hn)) * w3(hn)) ----
    hn = _rmsnorm(h_res, ffn_nw_ref[...])
    hn_b = hn.astype(jnp.bfloat16)
    g = jnp.dot(hn_b, w1_ref[...], preferred_element_type=jnp.float32)  # (B*S, HIDDEN)
    u = jnp.dot(hn_b, w3_ref[...], preferred_element_type=jnp.float32)
    act = (g * jax.nn.sigmoid(g) * u).astype(jnp.bfloat16)
    ff = jnp.dot(act, w2_ref[...], preferred_element_type=jnp.float32)  # (B*S, D)

    out_ref[...] = h_res + ff


def prepare_params(params):
    """One-time weight preprocessing for the kernel (done outside the kernel)."""
    inv_scale = 1.0 / math.sqrt(HEAD_DIM)

    def per_head_cols(w):   # (D, D) -> (N_HEADS, D, HEAD_DIM): output cols split by head
        return jnp.transpose(w.reshape(DIM, N_HEADS, HEAD_DIM), (1, 0, 2))

    def rot_cols(w):        # fold rotate_half into the projection's output columns
        return jnp.concatenate([-w[..., HEAD_DIM // 2:], w[..., : HEAD_DIM // 2]], axis=-1)

    wq_h = per_head_cols(params["wq"]) * inv_scale   # fold 1/sqrt(head_dim) into q
    wk_h = per_head_cols(params["wk"])
    bf = lambda a: a.astype(jnp.bfloat16)
    return {
        "wq_h": bf(wq_h),
        "wqr_h": bf(rot_cols(wq_h)),
        "wk_h": bf(wk_h),
        "wkr_h": bf(rot_cols(wk_h)),
        "wv_h": bf(per_head_cols(params["wv"])),
        "wo_h": bf(params["wo"].reshape(N_HEADS, HEAD_DIM, DIM)),
        "w1": bf(params["w1"]),
        "w2": bf(params["w2"]),
        "w3": bf(params["w3"]),
        "attn_norm_w": params["attn_norm_w"],
        "ffn_norm_w": params["ffn_norm_w"],
    }


def transformer_block(x, cos, sin, mask, kp):
    B, S, D = x.shape
    BS = B * S
    x2 = x.reshape(BS, D)

    # cos/sin tiled over the folded batch axis; block-diagonal causal mask
    cos_t = jnp.tile(cos, (B, 1))
    sin_t = jnp.tile(sin, (B, 1))
    idx = jnp.arange(BS)
    same_batch = (idx[:, None] // S) == (idx[None, :] // S)
    big_mask = jnp.where(same_batch, jnp.tile(mask, (B, B)), -1e9).astype(jnp.float32)

    spec2 = lambda shape: pl.BlockSpec(shape, lambda i: (0, 0))
    spec3 = lambda shape: pl.BlockSpec(shape, lambda i: (0, 0, 0))

    out2 = pl.pallas_call(
        transformer_block_kernel,
        out_shape=jax.ShapeDtypeStruct((BS, D), jnp.float32),
        grid_spec=pltpu.PrefetchScalarGridSpec(
            num_scalar_prefetch=0,
            grid=(1,),                              # batch folded: single grid step
            in_specs=[
                spec2((BS, D)),                     # x (flattened)
                spec2((BS, HEAD_DIM)),              # cos
                spec2((BS, HEAD_DIM)),              # sin
                spec2((BS, BS)),                    # block-diag additive mask
                spec3((N_HEADS, DIM, HEAD_DIM)),    # wq (scaled)
                spec3((N_HEADS, DIM, HEAD_DIM)),    # wq rotated (scaled)
                spec3((N_HEADS, DIM, HEAD_DIM)),    # wk
                spec3((N_HEADS, DIM, HEAD_DIM)),    # wk rotated
                spec3((N_HEADS, DIM, HEAD_DIM)),    # wv
                spec3((N_HEADS, HEAD_DIM, DIM)),    # wo (row blocks per head)
                spec2((DIM, HIDDEN)),               # w1
                spec2((HIDDEN, DIM)),               # w2
                spec2((DIM, HIDDEN)),               # w3
                spec2((1, DIM)),                    # attention_norm.weight
                spec2((1, DIM)),                    # ffn_norm.weight
            ],
            out_specs=pl.BlockSpec((BS, D), lambda i: (0, 0)),
        ),
        compiler_params=pltpu.CompilerParams(
            dimension_semantics=("arbitrary",)),
    )(
        x2, cos_t, sin_t, big_mask,
        kp["wq_h"], kp["wqr_h"], kp["wk_h"], kp["wkr_h"], kp["wv_h"], kp["wo_h"],
        kp["w1"], kp["w2"], kp["w3"],
        kp["attn_norm_w"], kp["ffn_norm_w"],
    )
    return out2.reshape(B, S, D)


# ---------------- pure-JAX reference (mirrors the PyTorch module, f32) ----------------
def reference_block(x, cos, sin, mask, params):
    def rmsnorm(v, w):
        ms = jnp.mean(v * v, axis=-1, keepdims=True)
        return v * jax.lax.rsqrt(ms + EPS) * w[0]

    def rotate_half(t):
        t1, t2 = t[..., : HEAD_DIM // 2], t[..., HEAD_DIM // 2:]
        return jnp.concatenate([-t2, t1], axis=-1)

    B, S, D = x.shape
    xn = rmsnorm(x, params["attn_norm_w"])
    xq = xn @ params["wq"]
    xk = xn @ params["wk"]
    xv = xn @ params["wv"]
    xq = xq.reshape(B, S, N_HEADS, HEAD_DIM)
    xk = xk.reshape(B, S, N_HEADS, HEAD_DIM)
    xv = xv.reshape(B, S, N_HEADS, HEAD_DIM)
    c = cos[None, :, None, :]
    s_ = sin[None, :, None, :]
    xq = xq * c + rotate_half(xq) * s_
    xk = xk * c + rotate_half(xk) * s_
    q = jnp.transpose(xq, (0, 2, 1, 3))
    k = jnp.transpose(xk, (0, 2, 1, 3))
    v = jnp.transpose(xv, (0, 2, 1, 3))
    scores = jnp.einsum("bhqd,bhkd->bhqk", q, k) / math.sqrt(HEAD_DIM)
    scores = scores + mask[None, None]
    scores = jax.nn.softmax(scores, axis=-1)
    out = jnp.einsum("bhqk,bhkd->bhqd", scores, v)
    out = jnp.transpose(out, (0, 2, 1, 3)).reshape(B, S, D)
    h = x + out @ params["wo"]
    hn = rmsnorm(h, params["ffn_norm_w"])
    g = hn @ params["w1"]
    u = hn @ params["w3"]
    ff = (g * jax.nn.sigmoid(g) * u) @ params["w2"]
    return h + ff


if __name__ == "__main__":
    key = jax.random.PRNGKey(0)
    ks = jax.random.split(key, 10)

    def init(k, shape, scale=0.02):
        return (scale * jax.random.normal(k, shape)).astype(jnp.float32)

    # weights stored (in_features, out_features) == PyTorch weight.T
    params = {
        "wq": init(ks[0], (DIM, DIM)),
        "wk": init(ks[1], (DIM, DIM)),
        "wv": init(ks[2], (DIM, DIM)),
        "wo": init(ks[3], (DIM, DIM)),
        "w1": init(ks[4], (DIM, HIDDEN)),
        "w2": init(ks[5], (HIDDEN, DIM)),
        "w3": init(ks[6], (DIM, HIDDEN)),
        "attn_norm_w": jnp.ones((1, DIM), jnp.float32),
        "ffn_norm_w": jnp.ones((1, DIM), jnp.float32),
    }

    x = jax.random.normal(ks[7], (BATCH, SEQ, DIM), dtype=jnp.float32)

    # rotary tables (seq, head_dim)
    inv_freq = 1.0 / (10000.0 ** (jnp.arange(0, HEAD_DIM, 2, dtype=jnp.float32) / HEAD_DIM))
    pos = jnp.arange(SEQ, dtype=jnp.float32)
    freqs = jnp.einsum("s,d->sd", pos, inv_freq)          # (S, HEAD_DIM/2)
    emb = jnp.concatenate([freqs, freqs], axis=-1)        # (S, HEAD_DIM)
    cos = jnp.cos(emb)
    sin = jnp.sin(emb)

    # additive causal mask
    mask = jnp.where(
        jnp.arange(SEQ)[:, None] >= jnp.arange(SEQ)[None, :],
        0.0, -1e9).astype(jnp.float32)

    kparams = prepare_params(params)
    out = transformer_block(x, cos, sin, mask, kparams)
    out = jax.block_until_ready(out)

    ref = reference_block(x, cos, sin, mask, params)
    assert out.shape == (BATCH, SEQ, DIM)
    # bf16 matmul operands + approx reciprocal => loosen tolerance vs f32 reference
    assert jnp.allclose(out, ref, atol=1e-2, rtol=1e-2), "mismatch vs reference"

    print("KERNEL_OK")
</pallas_src>

<mosaic_0001>
module attributes {stable_mosaic.version = 11 : i64} {
  func.func @transformer_block_kernel(%arg0: i32, %arg1: memref<16x32xf32, #tpu.memory_space<vmem>>, %arg2: memref<16x8xf32, #tpu.memory_space<vmem>>, %arg3: memref<16x8xf32, #tpu.memory_space<vmem>>, %arg4: memref<16x16xf32, #tpu.memory_space<vmem>>, %arg5: memref<4x32x8xbf16, #tpu.memory_space<vmem>>, %arg6: memref<4x32x8xbf16, #tpu.memory_space<vmem>>, %arg7: memref<4x32x8xbf16, #tpu.memory_space<vmem>>, %arg8: memref<4x32x8xbf16, #tpu.memory_space<vmem>>, %arg9: memref<4x32x8xbf16, #tpu.memory_space<vmem>>, %arg10: memref<4x8x32xbf16, #tpu.memory_space<vmem>>, %arg11: memref<32x256xbf16, #tpu.memory_space<vmem>>, %arg12: memref<256x32xbf16, #tpu.memory_space<vmem>>, %arg13: memref<32x256xbf16, #tpu.memory_space<vmem>>, %arg14: memref<1x32xf32, #tpu.memory_space<vmem>>, %arg15: memref<1x32xf32, #tpu.memory_space<vmem>>, %arg16: memref<16x32xf32, #tpu.memory_space<vmem>>) attributes {dimension_semantics = [#tpu.dimension_semantics<arbitrary>], iteration_bounds = array<i64: 1>, scalar_prefetch = 0 : i64, scratch_operands = 0 : i64, tpu.core_type = #tpu.core_type<tc>, window_params = [{pipeline_mode = #tpu.pipeline_mode<synchronous>, transform_indices = @transform_0, window_bounds = array<i64: 16, 32>}, {pipeline_mode = #tpu.pipeline_mode<synchronous>, transform_indices = @transform_1, window_bounds = array<i64: 16, 8>}, {pipeline_mode = #tpu.pipeline_mode<synchronous>, transform_indices = @transform_2, window_bounds = array<i64: 16, 8>}, {pipeline_mode = #tpu.pipeline_mode<synchronous>, transform_indices = @transform_3, window_bounds = array<i64: 16, 16>}, {pipeline_mode = #tpu.pipeline_mode<synchronous>, transform_indices = @transform_4, window_bounds = array<i64: 4, 32, 8>}, {pipeline_mode = #tpu.pipeline_mode<synchronous>, transform_indices = @transform_5, window_bounds = array<i64: 4, 32, 8>}, {pipeline_mode = #tpu.pipeline_mode<synchronous>, transform_indices = @transform_6, window_bounds = array<i64: 4, 32, 8>}, {pipeline_mode = #tpu.pipeline_mode<synchronous>, transform_indices = @transform_7, window_bounds = array<i64: 4, 32, 8>}, {pipeline_mode = #tpu.pipeline_mode<synchronous>, transform_indices = @transform_8, window_bounds = array<i64: 4, 32, 8>}, {pipeline_mode = #tpu.pipeline_mode<synchronous>, transform_indices = @transform_9, window_bounds = array<i64: 4, 8, 32>}, {pipeline_mode = #tpu.pipeline_mode<synchronous>, transform_indices = @transform_10, window_bounds = array<i64: 32, 256>}, {pipeline_mode = #tpu.pipeline_mode<synchronous>, transform_indices = @transform_11, window_bounds = array<i64: 256, 32>}, {pipeline_mode = #tpu.pipeline_mode<synchronous>, transform_indices = @transform_12, window_bounds = array<i64: 32, 256>}, {pipeline_mode = #tpu.pipeline_mode<synchronous>, transform_indices = @transform_13, window_bounds = array<i64: 1, 32>}, {pipeline_mode = #tpu.pipeline_mode<synchronous>, transform_indices = @transform_14, window_bounds = array<i64: 1, 32>}, {pipeline_mode = #tpu.pipeline_mode<synchronous>, transform_indices = @transform_15, window_bounds = array<i64: 16, 32>}]} {
    %c0 = arith.constant 0 : index
    %c0_0 = arith.constant 0 : index
    %0 = vector.load %arg1[%c0, %c0_0] : memref<16x32xf32, #tpu.memory_space<vmem>>, vector<16x32xf32>
    %c0_1 = arith.constant 0 : index
    %c0_2 = arith.constant 0 : index
    %1 = vector.load %arg2[%c0_1, %c0_2] : memref<16x8xf32, #tpu.memory_space<vmem>>, vector<16x8xf32>
    %c0_3 = arith.constant 0 : index
    %c0_4 = arith.constant 0 : index
    %2 = vector.load %arg3[%c0_3, %c0_4] : memref<16x8xf32, #tpu.memory_space<vmem>>, vector<16x8xf32>
    %c0_5 = arith.constant 0 : index
    %c0_6 = arith.constant 0 : index
    %3 = vector.load %arg4[%c0_5, %c0_6] : memref<16x16xf32, #tpu.memory_space<vmem>>, vector<16x16xf32>
    %c0_7 = arith.constant 0 : index
    %c0_8 = arith.constant 0 : index
    %4 = vector.load %arg14[%c0_7, %c0_8] : memref<1x32xf32, #tpu.memory_space<vmem>>, vector<1x32xf32>
    %5 = arith.mulf %0, %0 : vector<16x32xf32>
    %cst = arith.constant dense<0.000000e+00> : vector<16xf32>
    %6 = vector.multi_reduction <add>, %5, %cst [1] : vector<16x32xf32> to vector<16xf32>
    %7 = vector.shape_cast %6 : vector<16xf32> to vector<16x1xf32>
    %cst_9 = arith.constant 3.200000e+01 : f32
    %8 = vector.broadcast %cst_9 : f32 to vector<16x1xf32>
    %9 = arith.divf %7, %8 : vector<16x1xf32>
    %cst_10 = arith.constant 9.99999997E-7 : f32
    %10 = vector.broadcast %cst_10 : f32 to vector<16x1xf32>
    %11 = arith.addf %9, %10 : vector<16x1xf32>
    %12 = math.rsqrt %11 : vector<16x1xf32>
    %13 = vector.broadcast %12 : vector<16x1xf32> to vector<16x32xf32>
    %14 = arith.mulf %0, %13 : vector<16x32xf32>
    %15 = vector.broadcast %4 : vector<1x32xf32> to vector<16x32xf32>
    %16 = arith.mulf %14, %15 : vector<16x32xf32>
    %17 = arith.truncf %16 : vector<16x32xf32> to vector<16x32xbf16>
    %cst_11 = arith.constant 0.000000e+00 : f32
    %18 = vector.broadcast %cst_11 : f32 to vector<16x32xf32>
    %c0_12 = arith.constant 0 : index
    %c0_13 = arith.constant 0 : index
    %c0_14 = arith.constant 0 : index
    %19 = vector.load %arg5[%c0_12, %c0_13, %c0_14] : memref<4x32x8xbf16, #tpu.memory_space<vmem>>, vector<1x32x8xbf16>
    %20 = vector.shape_cast %19 : vector<1x32x8xbf16> to vector<32x8xbf16>
    %cst_15 = arith.constant dense<0.000000e+00> : vector<16x8xf32>
    %21 = tpu.matmul %17, %20, %cst_15 {dimension_numbers = #tpu.dot_dimension_numbers<[1], [0], [0], [1], [0, 0, 1, 1], [], []>} : vector<16x32xbf16>, vector<32x8xbf16>, vector<16x8xf32> -> vector<16x8xf32>
    %c0_16 = arith.constant 0 : index
    %c0_17 = arith.constant 0 : index
    %c0_18 = arith.constant 0 : index
    %22 = vector.load %arg6[%c0_16, %c0_17, %c0_18] : memref<4x32x8xbf16, #tpu.memory_space<vmem>>, vector<1x32x8xbf16>
    %23 = vector.shape_cast %22 : vector<1x32x8xbf16> to vector<32x8xbf16>
    %cst_19 = arith.constant dense<0.000000e+00> : vector<16x8xf32>
    %24 = tpu.matmul %17, %23, %cst_19 {dimension_numbers = #tpu.dot_dimension_numbers<[1], [0], [0], [1], [0, 0, 1, 1], [], []>} : vector<16x32xbf16>, vector<32x8xbf16>, vector<16x8xf32> -> vector<16x8xf32>
    %c0_20 = arith.constant 0 : index
    %c0_21 = arith.constant 0 : index
    %c0_22 = arith.constant 0 : index
    %25 = vector.load %arg7[%c0_20, %c0_21, %c0_22] : memref<4x32x8xbf16, #tpu.memory_space<vmem>>, vector<1x32x8xbf16>
    %26 = vector.shape_cast %25 : vector<1x32x8xbf16> to vector<32x8xbf16>
    %cst_23 = arith.constant dense<0.000000e+00> : vector<16x8xf32>
    %27 = tpu.matmul %17, %26, %cst_23 {dimension_numbers = #tpu.dot_dimension_numbers<[1], [0], [0], [1], [0, 0, 1, 1], [], []>} : vector<16x32xbf16>, vector<32x8xbf16>, vector<16x8xf32> -> vector<16x8xf32>
    %c0_24 = arith.constant 0 : index
    %c0_25 = arith.constant 0 : index
    %c0_26 = arith.constant 0 : index
    %28 = vector.load %arg8[%c0_24, %c0_25, %c0_26] : memref<4x32x8xbf16, #tpu.memory_space<vmem>>, vector<1x32x8xbf16>
    %29 = vector.shape_cast %28 : vector<1x32x8xbf16> to vector<32x8xbf16>
    %cst_27 = arith.constant dense<0.000000e+00> : vector<16x8xf32>
    %30 = tpu.matmul %17, %29, %cst_27 {dimension_numbers = #tpu.dot_dimension_numbers<[1], [0], [0], [1], [0, 0, 1, 1], [], []>} : vector<16x32xbf16>, vector<32x8xbf16>, vector<16x8xf32> -> vector<16x8xf32>
    %c0_28 = arith.constant 0 : index
    %c0_29 = arith.constant 0 : index
    %c0_30 = arith.constant 0 : index
    %31 = vector.load %arg9[%c0_28, %c0_29, %c0_30] : memref<4x32x8xbf16, #tpu.memory_space<vmem>>, vector<1x32x8xbf16>
    %32 = vector.shape_cast %31 : vector<1x32x8xbf16> to vector<32x8xbf16>
    %cst_31 = arith.constant dense<0.000000e+00> : vector<16x8xf32>
    %33 = tpu.matmul %17, %32, %cst_31 {dimension_numbers = #tpu.dot_dimension_numbers<[1], [0], [0], [1], [0, 0, 1, 1], [], []>} : vector<16x32xbf16>, vector<32x8xbf16>, vector<16x8xf32> -> vector<16x8xf32>
    %34 = arith.mulf %21, %1 : vector<16x8xf32>
    %35 = arith.mulf %24, %2 : vector<16x8xf32>
    %36 = arith.addf %34, %35 : vector<16x8xf32>
    %37 = arith.mulf %27, %1 : vector<16x8xf32>
    %38 = arith.mulf %30, %2 : vector<16x8xf32>
    %39 = arith.addf %37, %38 : vector<16x8xf32>
    %40 = arith.truncf %36 : vector<16x8xf32> to vector<16x8xbf16>
    %41 = arith.truncf %39 : vector<16x8xf32> to vector<16x8xbf16>
    %cst_32 = arith.constant dense<0.000000e+00> : vector<16x16xf32>
    %42 = tpu.matmul %40, %41, %cst_32 {dimension_numbers = #tpu.dot_dimension_numbers<[1], [1], [0], [0], [0, 0, 1, 0], [], []>} : vector<16x8xbf16>, vector<16x8xbf16>, vector<16x16xf32> -> vector<16x16xf32>
    %43 = arith.addf %42, %3 : vector<16x16xf32>
    %cst_33 = arith.constant dense<0xFF800000> : vector<16xf32>
    %44 = vector.multi_reduction <maximumf>, %43, %cst_33 [1] : vector<16x16xf32> to vector<16xf32>
    %45 = vector.shape_cast %44 : vector<16xf32> to vector<16x1xf32>
    %46 = vector.broadcast %45 : vector<16x1xf32> to vector<16x16xf32>
    %47 = arith.subf %43, %46 : vector<16x16xf32>
    %48 = math.exp %47 : vector<16x16xf32>
    %cst_34 = arith.constant dense<0.000000e+00> : vector<16xf32>
    %49 = vector.multi_reduction <add>, %48, %cst_34 [1] : vector<16x16xf32> to vector<16xf32>
    %50 = vector.shape_cast %49 : vector<16xf32> to vector<16x1xf32>
    %51 = tpu.reciprocal %50 {approx = true} : vector<16x1xf32> -> vector<16x1xf32>
    %52 = vector.broadcast %51 : vector<16x1xf32> to vector<16x16xf32>
    %53 = arith.mulf %48, %52 : vector<16x16xf32>
    %54 = arith.truncf %53 : vector<16x16xf32> to vector<16x16xbf16>
    %55 = arith.truncf %33 : vector<16x8xf32> to vector<16x8xbf16>
    %cst_35 = arith.constant dense<0.000000e+00> : vector<16x8xf32>
    %56 = tpu.matmul %54, %55, %cst_35 {dimension_numbers = #tpu.dot_dimension_numbers<[1], [0], [0], [1], [0, 0, 1, 1], [], []>} : vector<16x16xbf16>, vector<16x8xbf16>, vector<16x8xf32> -> vector<16x8xf32>
    %57 = arith.truncf %56 : vector<16x8xf32> to vector<16x8xbf16>
    %c0_36 = arith.constant 0 : index
    %c0_37 = arith.constant 0 : index
    %c0_38 = arith.constant 0 : index
    %58 = vector.load %arg10[%c0_36, %c0_37, %c0_38] : memref<4x8x32xbf16, #tpu.memory_space<vmem>>, vector<1x8x32xbf16>
    %59 = vector.shape_cast %58 : vector<1x8x32xbf16> to vector<8x32xbf16>
    %cst_39 = arith.constant dense<0.000000e+00> : vector<16x32xf32>
    %60 = tpu.matmul %57, %59, %cst_39 {dimension_numbers = #tpu.dot_dimension_numbers<[1], [0], [0], [1], [0, 0, 1, 1], [], []>} : vector<16x8xbf16>, vector<8x32xbf16>, vector<16x32xf32> -> vector<16x32xf32>
    %61 = arith.addf %18, %60 : vector<16x32xf32>
    %c1 = arith.constant 1 : index
    %c0_40 = arith.constant 0 : index
    %c0_41 = arith.constant 0 : index
    %62 = vector.load %arg5[%c1, %c0_40, %c0_41] : memref<4x32x8xbf16, #tpu.memory_space<vmem>>, vector<1x32x8xbf16>
    %63 = vector.shape_cast %62 : vector<1x32x8xbf16> to vector<32x8xbf16>
    %cst_42 = arith.constant dense<0.000000e+00> : vector<16x8xf32>
    %64 = tpu.matmul %17, %63, %cst_42 {dimension_numbers = #tpu.dot_dimension_numbers<[1], [0], [0], [1], [0, 0, 1, 1], [], []>} : vector<16x32xbf16>, vector<32x8xbf16>, vector<16x8xf32> -> vector<16x8xf32>
    %c1_43 = arith.constant 1 : index
    %c0_44 = arith.constant 0 : index
    %c0_45 = arith.constant 0 : index
    %65 = vector.load %arg6[%c1_43, %c0_44, %c0_45] : memref<4x32x8xbf16, #tpu.memory_space<vmem>>, vector<1x32x8xbf16>
    %66 = vector.shape_cast %65 : vector<1x32x8xbf16> to vector<32x8xbf16>
    %cst_46 = arith.constant dense<0.000000e+00> : vector<16x8xf32>
    %67 = tpu.matmul %17, %66, %cst_46 {dimension_numbers = #tpu.dot_dimension_numbers<[1], [0], [0], [1], [0, 0, 1, 1], [], []>} : vector<16x32xbf16>, vector<32x8xbf16>, vector<16x8xf32> -> vector<16x8xf32>
    %c1_47 = arith.constant 1 : index
    %c0_48 = arith.constant 0 : index
    %c0_49 = arith.constant 0 : index
    %68 = vector.load %arg7[%c1_47, %c0_48, %c0_49] : memref<4x32x8xbf16, #tpu.memory_space<vmem>>, vector<1x32x8xbf16>
    %69 = vector.shape_cast %68 : vector<1x32x8xbf16> to vector<32x8xbf16>
    %cst_50 = arith.constant dense<0.000000e+00> : vector<16x8xf32>
    %70 = tpu.matmul %17, %69, %cst_50 {dimension_numbers = #tpu.dot_dimension_numbers<[1], [0], [0], [1], [0, 0, 1, 1], [], []>} : vector<16x32xbf16>, vector<32x8xbf16>, vector<16x8xf32> -> vector<16x8xf32>
    %c1_51 = arith.constant 1 : index
    %c0_52 = arith.constant 0 : index
    %c0_53 = arith.constant 0 : index
    %71 = vector.load %arg8[%c1_51, %c0_52, %c0_53] : memref<4x32x8xbf16, #tpu.memory_space<vmem>>, vector<1x32x8xbf16>
    %72 = vector.shape_cast %71 : vector<1x32x8xbf16> to vector<32x8xbf16>
    %cst_54 = arith.constant dense<0.000000e+00> : vector<16x8xf32>
    %73 = tpu.matmul %17, %72, %cst_54 {dimension_numbers = #tpu.dot_dimension_numbers<[1], [0], [0], [1], [0, 0, 1, 1], [], []>} : vector<16x32xbf16>, vector<32x8xbf16>, vector<16x8xf32> -> vector<16x8xf32>
    %c1_55 = arith.constant 1 : index
    %c0_56 = arith.constant 0 : index
    %c0_57 = arith.constant 0 : index
    %74 = vector.load %arg9[%c1_55, %c0_56, %c0_57] : memref<4x32x8xbf16, #tpu.memory_space<vmem>>, vector<1x32x8xbf16>
    %75 = vector.shape_cast %74 : vector<1x32x8xbf16> to vector<32x8xbf16>
    %cst_58 = arith.constant dense<0.000000e+00> : vector<16x8xf32>
    %76 = tpu.matmul %17, %75, %cst_58 {dimension_numbers = #tpu.dot_dimension_numbers<[1], [0], [0], [1], [0, 0, 1, 1], [], []>} : vector<16x32xbf16>, vector<32x8xbf16>, vector<16x8xf32> -> vector<16x8xf32>
    %77 = arith.mulf %64, %1 : vector<16x8xf32>
    %78 = arith.mulf %67, %2 : vector<16x8xf32>
    %79 = arith.addf %77, %78 : vector<16x8xf32>
    %80 = arith.mulf %70, %1 : vector<16x8xf32>
    %81 = arith.mulf %73, %2 : vector<16x8xf32>
    %82 = arith.addf %80, %81 : vector<16x8xf32>
    %83 = arith.truncf %79 : vector<16x8xf32> to vector<16x8xbf16>
    %84 = arith.truncf %82 : vector<16x8xf32> to vector<16x8xbf16>
    %cst_59 = arith.constant dense<0.000000e+00> : vector<16x16xf32>
    %85 = tpu.matmul %83, %84, %cst_59 {dimension_numbers = #tpu.dot_dimension_numbers<[1], [1], [0], [0], [0, 0, 1, 0], [], []>} : vector<16x8xbf16>, vector<16x8xbf16>, vector<16x16xf32> -> vector<16x16xf32>
    %86 = arith.addf %85, %3 : vector<16x16xf32>
    %cst_60 = arith.constant dense<0xFF800000> : vector<16xf32>
    %87 = vector.multi_reduction <maximumf>, %86, %cst_60 [1] : vector<16x16xf32> to vector<16xf32>
    %88 = vector.shape_cast %87 : vector<16xf32> to vector<16x1xf32>
    %89 = vector.broadcast %88 : vector<16x1xf32> to vector<16x16xf32>
    %90 = arith.subf %86, %89 : vector<16x16xf32>
    %91 = math.exp %90 : vector<16x16xf32>
    %cst_61 = arith.constant dense<0.000000e+00> : vector<16xf32>
    %92 = vector.multi_reduction <add>, %91, %cst_61 [1] : vector<16x16xf32> to vector<16xf32>
    %93 = vector.shape_cast %92 : vector<16xf32> to vector<16x1xf32>
    %94 = tpu.reciprocal %93 {approx = true} : vector<16x1xf32> -> vector<16x1xf32>
    %95 = vector.broadcast %94 : vector<16x1xf32> to vector<16x16xf32>
    %96 = arith.mulf %91, %95 : vector<16x16xf32>
    %97 = arith.truncf %96 : vector<16x16xf32> to vector<16x16xbf16>
    %98 = arith.truncf %76 : vector<16x8xf32> to vector<16x8xbf16>
    %cst_62 = arith.constant dense<0.000000e+00> : vector<16x8xf32>
    %99 = tpu.matmul %97, %98, %cst_62 {dimension_numbers = #tpu.dot_dimension_numbers<[1], [0], [0], [1], [0, 0, 1, 1], [], []>} : vector<16x16xbf16>, vector<16x8xbf16>, vector<16x8xf32> -> vector<16x8xf32>
    %100 = arith.truncf %99 : vector<16x8xf32> to vector<16x8xbf16>
    %c1_63 = arith.constant 1 : index
    %c0_64 = arith.constant 0 : index
    %c0_65 = arith.constant 0 : index
    %101 = vector.load %arg10[%c1_63, %c0_64, %c0_65] : memref<4x8x32xbf16, #tpu.memory_space<vmem>>, vector<1x8x32xbf16>
    %102 = vector.shape_cast %101 : vector<1x8x32xbf16> to vector<8x32xbf16>
    %cst_66 = arith.constant dense<0.000000e+00> : vector<16x32xf32>
    %103 = tpu.matmul %100, %102, %cst_66 {dimension_numbers = #tpu.dot_dimension_numbers<[1], [0], [0], [1], [0, 0, 1, 1], [], []>} : vector<16x8xbf16>, vector<8x32xbf16>, vector<16x32xf32> -> vector<16x32xf32>
    %104 = arith.addf %61, %103 : vector<16x32xf32>
    %c2 = arith.constant 2 : index
    %c0_67 = arith.constant 0 : index
    %c0_68 = arith.constant 0 : index
    %105 = vector.load %arg5[%c2, %c0_67, %c0_68] : memref<4x32x8xbf16, #tpu.memory_space<vmem>>, vector<1x32x8xbf16>
    %106 = vector.shape_cast %105 : vector<1x32x8xbf16> to vector<32x8xbf16>
    %cst_69 = arith.constant dense<0.000000e+00> : vector<16x8xf32>
    %107 = tpu.matmul %17, %106, %cst_69 {dimension_numbers = #tpu.dot_dimension_numbers<[1], [0], [0], [1], [0, 0, 1, 1], [], []>} : vector<16x32xbf16>, vector<32x8xbf16>, vector<16x8xf32> -> vector<16x8xf32>
    %c2_70 = arith.constant 2 : index
    %c0_71 = arith.constant 0 : index
    %c0_72 = arith.constant 0 : index
    %108 = vector.load %arg6[%c2_70, %c0_71, %c0_72] : memref<4x32x8xbf16, #tpu.memory_space<vmem>>, vector<1x32x8xbf16>
    %109 = vector.shape_cast %108 : vector<1x32x8xbf16> to vector<32x8xbf16>
    %cst_73 = arith.constant dense<0.000000e+00> : vector<16x8xf32>
    %110 = tpu.matmul %17, %109, %cst_73 {dimension_numbers = #tpu.dot_dimension_numbers<[1], [0], [0], [1], [0, 0, 1, 1], [], []>} : vector<16x32xbf16>, vector<32x8xbf16>, vector<16x8xf32> -> vector<16x8xf32>
    %c2_74 = arith.constant 2 : index
    %c0_75 = arith.constant 0 : index
    %c0_76 = arith.constant 0 : index
    %111 = vector.load %arg7[%c2_74, %c0_75, %c0_76] : memref<4x32x8xbf16, #tpu.memory_space<vmem>>, vector<1x32x8xbf16>
    %112 = vector.shape_cast %111 : vector<1x32x8xbf16> to vector<32x8xbf16>
    %cst_77 = arith.constant dense<0.000000e+00> : vector<16x8xf32>
    %113 = tpu.matmul %17, %112, %cst_77 {dimension_numbers = #tpu.dot_dimension_numbers<[1], [0], [0], [1], [0, 0, 1, 1], [], []>} : vector<16x32xbf16>, vector<32x8xbf16>, vector<16x8xf32> -> vector<16x8xf32>
    %c2_78 = arith.constant 2 : index
    %c0_79 = arith.constant 0 : index
    %c0_80 = arith.constant 0 : index
    %114 = vector.load %arg8[%c2_78, %c0_79, %c0_80] : memref<4x32x8xbf16, #tpu.memory_space<vmem>>, vector<1x32x8xbf16>
    %115 = vector.shape_cast %114 : vector<1x32x8xbf16> to vector<32x8xbf16>
    %cst_81 = arith.constant dense<0.000000e+00> : vector<16x8xf32>
    %116 = tpu.matmul %17, %115, %cst_81 {dimension_numbers = #tpu.dot_dimension_numbers<[1], [0], [0], [1], [0, 0, 1, 1], [], []>} : vector<16x32xbf16>, vector<32x8xbf16>, vector<16x8xf32> -> vector<16x8xf32>
    %c2_82 = arith.constant 2 : index
    %c0_83 = arith.constant 0 : index
    %c0_84 = arith.constant 0 : index
    %117 = vector.load %arg9[%c2_82, %c0_83, %c0_84] : memref<4x32x8xbf16, #tpu.memory_space<vmem>>, vector<1x32x8xbf16>
    %118 = vector.shape_cast %117 : vector<1x32x8xbf16> to vector<32x8xbf16>
    %cst_85 = arith.constant dense<0.000000e+00> : vector<16x8xf32>
    %119 = tpu.matmul %17, %118, %cst_85 {dimension_numbers = #tpu.dot_dimension_numbers<[1], [0], [0], [1], [0, 0, 1, 1], [], []>} : vector<16x32xbf16>, vector<32x8xbf16>, vector<16x8xf32> -> vector<16x8xf32>
    %120 = arith.mulf %107, %1 : vector<16x8xf32>
    %121 = arith.mulf %110, %2 : vector<16x8xf32>
    %122 = arith.addf %120, %121 : vector<16x8xf32>
    %123 = arith.mulf %113, %1 : vector<16x8xf32>
    %124 = arith.mulf %116, %2 : vector<16x8xf32>
    %125 = arith.addf %123, %124 : vector<16x8xf32>
    %126 = arith.truncf %122 : vector<16x8xf32> to vector<16x8xbf16>
    %127 = arith.truncf %125 : vector<16x8xf32> to vector<16x8xbf16>
    %cst_86 = arith.constant dense<0.000000e+00> : vector<16x16xf32>
    %128 = tpu.matmul %126, %127, %cst_86 {dimension_numbers = #tpu.dot_dimension_numbers<[1], [1], [0], [0], [0, 0, 1, 0], [], []>} : vector<16x8xbf16>, vector<16x8xbf16>, vector<16x16xf32> -> vector<16x16xf32>
    %129 = arith.addf %128, %3 : vector<16x16xf32>
    %cst_87 = arith.constant dense<0xFF800000> : vector<16xf32>
    %130 = vector.multi_reduction <maximumf>, %129, %cst_87 [1] : vector<16x16xf32> to vector<16xf32>
    %131 = vector.shape_cast %130 : vector<16xf32> to vector<16x1xf32>
    %132 = vector.broadcast %131 : vector<16x1xf32> to vector<16x16xf32>
    %133 = arith.subf %129, %132 : vector<16x16xf32>
    %134 = math.exp %133 : vector<16x16xf32>
    %cst_88 = arith.constant dense<0.000000e+00> : vector<16xf32>
    %135 = vector.multi_reduction <add>, %134, %cst_88 [1] : vector<16x16xf32> to vector<16xf32>
    %136 = vector.shape_cast %135 : vector<16xf32> to vector<16x1xf32>
    %137 = tpu.reciprocal %136 {approx = true} : vector<16x1xf32> -> vector<16x1xf32>
    %138 = vector.broadcast %137 : vector<16x1xf32> to vector<16x16xf32>
    %139 = arith.mulf %134, %138 : vector<16x16xf32>
    %140 = arith.truncf %139 : vector<16x16xf32> to vector<16x16xbf16>
    %141 = arith.truncf %119 : vector<16x8xf32> to vector<16x8xbf16>
    %cst_89 = arith.constant dense<0.000000e+00> : vector<16x8xf32>
    %142 = tpu.matmul %140, %141, %cst_89 {dimension_numbers = #tpu.dot_dimension_numbers<[1], [0], [0], [1], [0, 0, 1, 1], [], []>} : vector<16x16xbf16>, vector<16x8xbf16>, vector<16x8xf32> -> vector<16x8xf32>
    %143 = arith.truncf %142 : vector<16x8xf32> to vector<16x8xbf16>
    %c2_90 = arith.constant 2 : index
    %c0_91 = arith.constant 0 : index
    %c0_92 = arith.constant 0 : index
    %144 = vector.load %arg10[%c2_90, %c0_91, %c0_92] : memref<4x8x32xbf16, #tpu.memory_space<vmem>>, vector<1x8x32xbf16>
    %145 = vector.shape_cast %144 : vector<1x8x32xbf16> to vector<8x32xbf16>
    %cst_93 = arith.constant dense<0.000000e+00> : vector<16x32xf32>
    %146 = tpu.matmul %143, %145, %cst_93 {dimension_numbers = #tpu.dot_dimension_numbers<[1], [0], [0], [1], [0, 0, 1, 1], [], []>} : vector<16x8xbf16>, vector<8x32xbf16>, vector<16x32xf32> -> vector<16x32xf32>
    %147 = arith.addf %104, %146 : vector<16x32xf32>
    %c3 = arith.constant 3 : index
    %c0_94 = arith.constant 0 : index
    %c0_95 = arith.constant 0 : index
    %148 = vector.load %arg5[%c3, %c0_94, %c0_95] : memref<4x32x8xbf16, #tpu.memory_space<vmem>>, vector<1x32x8xbf16>
    %149 = vector.shape_cast %148 : vector<1x32x8xbf16> to vector<32x8xbf16>
    %cst_96 = arith.constant dense<0.000000e+00> : vector<16x8xf32>
    %150 = tpu.matmul %17, %149, %cst_96 {dimension_numbers = #tpu.dot_dimension_numbers<[1], [0], [0], [1], [0, 0, 1, 1], [], []>} : vector<16x32xbf16>, vector<32x8xbf16>, vector<16x8xf32> -> vector<16x8xf32>
    %c3_97 = arith.constant 3 : index
    %c0_98 = arith.constant 0 : index
    %c0_99 = arith.constant 0 : index
    %151 = vector.load %arg6[%c3_97, %c0_98, %c0_99] : memref<4x32x8xbf16, #tpu.memory_space<vmem>>, vector<1x32x8xbf16>
    %152 = vector.shape_cast %151 : vector<1x32x8xbf16> to vector<32x8xbf16>
    %cst_100 = arith.constant dense<0.000000e+00> : vector<16x8xf32>
    %153 = tpu.matmul %17, %152, %cst_100 {dimension_numbers = #tpu.dot_dimension_numbers<[1], [0], [0], [1], [0, 0, 1, 1], [], []>} : vector<16x32xbf16>, vector<32x8xbf16>, vector<16x8xf32> -> vector<16x8xf32>
    %c3_101 = arith.constant 3 : index
    %c0_102 = arith.constant 0 : index
    %c0_103 = arith.constant 0 : index
    %154 = vector.load %arg7[%c3_101, %c0_102, %c0_103] : memref<4x32x8xbf16, #tpu.memory_space<vmem>>, vector<1x32x8xbf16>
    %155 = vector.shape_cast %154 : vector<1x32x8xbf16> to vector<32x8xbf16>
    %cst_104 = arith.constant dense<0.000000e+00> : vector<16x8xf32>
    %156 = tpu.matmul %17, %155, %cst_104 {dimension_numbers = #tpu.dot_dimension_numbers<[1], [0], [0], [1], [0, 0, 1, 1], [], []>} : vector<16x32xbf16>, vector<32x8xbf16>, vector<16x8xf32> -> vector<16x8xf32>
    %c3_105 = arith.constant 3 : index
    %c0_106 = arith.constant 0 : index
    %c0_107 = arith.constant 0 : index
    %157 = vector.load %arg8[%c3_105, %c0_106, %c0_107] : memref<4x32x8xbf16, #tpu.memory_space<vmem>>, vector<1x32x8xbf16>
    %158 = vector.shape_cast %157 : vector<1x32x8xbf16> to vector<32x8xbf16>
    %cst_108 = arith.constant dense<0.000000e+00> : vector<16x8xf32>
    %159 = tpu.matmul %17, %158, %cst_108 {dimension_numbers = #tpu.dot_dimension_numbers<[1], [0], [0], [1], [0, 0, 1, 1], [], []>} : vector<16x32xbf16>, vector<32x8xbf16>, vector<16x8xf32> -> vector<16x8xf32>
    %c3_109 = arith.constant 3 : index
    %c0_110 = arith.constant 0 : index
    %c0_111 = arith.constant 0 : index
    %160 = vector.load %arg9[%c3_109, %c0_110, %c0_111] : memref<4x32x8xbf16, #tpu.memory_space<vmem>>, vector<1x32x8xbf16>
    %161 = vector.shape_cast %160 : vector<1x32x8xbf16> to vector<32x8xbf16>
    %cst_112 = arith.constant dense<0.000000e+00> : vector<16x8xf32>
    %162 = tpu.matmul %17, %161, %cst_112 {dimension_numbers = #tpu.dot_dimension_numbers<[1], [0], [0], [1], [0, 0, 1, 1], [], []>} : vector<16x32xbf16>, vector<32x8xbf16>, vector<16x8xf32> -> vector<16x8xf32>
    %163 = arith.mulf %150, %1 : vector<16x8xf32>
    %164 = arith.mulf %153, %2 : vector<16x8xf32>
    %165 = arith.addf %163, %164 : vector<16x8xf32>
    %166 = arith.mulf %156, %1 : vector<16x8xf32>
    %167 = arith.mulf %159, %2 : vector<16x8xf32>
    %168 = arith.addf %166, %167 : vector<16x8xf32>
    %169 = arith.truncf %165 : vector<16x8xf32> to vector<16x8xbf16>
    %170 = arith.truncf %168 : vector<16x8xf32> to vector<16x8xbf16>
    %cst_113 = arith.constant dense<0.000000e+00> : vector<16x16xf32>
    %171 = tpu.matmul %169, %170, %cst_113 {dimension_numbers = #tpu.dot_dimension_numbers<[1], [1], [0], [0], [0, 0, 1, 0], [], []>} : vector<16x8xbf16>, vector<16x8xbf16>, vector<16x16xf32> -> vector<16x16xf32>
    %172 = arith.addf %171, %3 : vector<16x16xf32>
    %cst_114 = arith.constant dense<0xFF800000> : vector<16xf32>
    %173 = vector.multi_reduction <maximumf>, %172, %cst_114 [1] : vector<16x16xf32> to vector<16xf32>
    %174 = vector.shape_cast %173 : vector<16xf32> to vector<16x1xf32>
    %175 = vector.broadcast %174 : vector<16x1xf32> to vector<16x16xf32>
    %176 = arith.subf %172, %175 : vector<16x16xf32>
    %177 = math.exp %176 : vector<16x16xf32>
    %cst_115 = arith.constant dense<0.000000e+00> : vector<16xf32>
    %178 = vector.multi_reduction <add>, %177, %cst_115 [1] : vector<16x16xf32> to vector<16xf32>
    %179 = vector.shape_cast %178 : vector<16xf32> to vector<16x1xf32>
    %180 = tpu.reciprocal %179 {approx = true} : vector<16x1xf32> -> vector<16x1xf32>
    %181 = vector.broadcast %180 : vector<16x1xf32> to vector<16x16xf32>
    %182 = arith.mulf %177, %181 : vector<16x16xf32>
    %183 = arith.truncf %182 : vector<16x16xf32> to vector<16x16xbf16>
    %184 = arith.truncf %162 : vector<16x8xf32> to vector<16x8xbf16>
    %cst_116 = arith.constant dense<0.000000e+00> : vector<16x8xf32>
    %185 = tpu.matmul %183, %184, %cst_116 {dimension_numbers = #tpu.dot_dimension_numbers<[1], [0], [0], [1], [0, 0, 1, 1], [], []>} : vector<16x16xbf16>, vector<16x8xbf16>, vector<16x8xf32> -> vector<16x8xf32>
    %186 = arith.truncf %185 : vector<16x8xf32> to vector<16x8xbf16>
    %c3_117 = arith.constant 3 : index
    %c0_118 = arith.constant 0 : index
    %c0_119 = arith.constant 0 : index
    %187 = vector.load %arg10[%c3_117, %c0_118, %c0_119] : memref<4x8x32xbf16, #tpu.memory_space<vmem>>, vector<1x8x32xbf16>
    %188 = vector.shape_cast %187 : vector<1x8x32xbf16> to vector<8x32xbf16>
    %cst_120 = arith.constant dense<0.000000e+00> : vector<16x32xf32>
    %189 = tpu.matmul %186, %188, %cst_120 {dimension_numbers = #tpu.dot_dimension_numbers<[1], [0], [0], [1], [0, 0, 1, 1], [], []>} : vector<16x8xbf16>, vector<8x32xbf16>, vector<16x32xf32> -> vector<16x32xf32>
    %190 = arith.addf %147, %189 : vector<16x32xf32>
    %191 = arith.addf %0, %190 : vector<16x32xf32>
    %c0_121 = arith.constant 0 : index
    %c0_122 = arith.constant 0 : index
    %192 = vector.load %arg15[%c0_121, %c0_122] : memref<1x32xf32, #tpu.memory_space<vmem>>, vector<1x32xf32>
    %193 = arith.mulf %191, %191 : vector<16x32xf32>
    %cst_123 = arith.constant dense<0.000000e+00> : vector<16xf32>
    %194 = vector.multi_reduction <add>, %193, %cst_123 [1] : vector<16x32xf32> to vector<16xf32>
    %195 = vector.shape_cast %194 : vector<16xf32> to vector<16x1xf32>
    %cst_124 = arith.constant 3.200000e+01 : f32
    %196 = vector.broadcast %cst_124 : f32 to vector<16x1xf32>
    %197 = arith.divf %195, %196 : vector<16x1xf32>
    %cst_125 = arith.constant 9.99999997E-7 : f32
    %198 = vector.broadcast %cst_125 : f32 to vector<16x1xf32>
    %199 = arith.addf %197, %198 : vector<16x1xf32>
    %200 = math.rsqrt %199 : vector<16x1xf32>
    %201 = vector.broadcast %200 : vector<16x1xf32> to vector<16x32xf32>
    %202 = arith.mulf %191, %201 : vector<16x32xf32>
    %203 = vector.broadcast %192 : vector<1x32xf32> to vector<16x32xf32>
    %204 = arith.mulf %202, %203 : vector<16x32xf32>
    %205 = arith.truncf %204 : vector<16x32xf32> to vector<16x32xbf16>
    %c0_126 = arith.constant 0 : index
    %c0_127 = arith.constant 0 : index
    %206 = vector.load %arg11[%c0_126, %c0_127] : memref<32x256xbf16, #tpu.memory_space<vmem>>, vector<32x256xbf16>
    %cst_128 = arith.constant dense<0.000000e+00> : vector<16x256xf32>
    %207 = tpu.matmul %205, %206, %cst_128 {dimension_numbers = #tpu.dot_dimension_numbers<[1], [0], [0], [1], [0, 0, 1, 1], [], []>} : vector<16x32xbf16>, vector<32x256xbf16>, vector<16x256xf32> -> vector<16x256xf32>
    %c0_129 = arith.constant 0 : index
    %c0_130 = arith.constant 0 : index
    %208 = vector.load %arg13[%c0_129, %c0_130] : memref<32x256xbf16, #tpu.memory_space<vmem>>, vector<32x256xbf16>
    %cst_131 = arith.constant dense<0.000000e+00> : vector<16x256xf32>
    %209 = tpu.matmul %205, %208, %cst_131 {dimension_numbers = #tpu.dot_dimension_numbers<[1], [0], [0], [1], [0, 0, 1, 1], [], []>} : vector<16x32xbf16>, vector<32x256xbf16>, vector<16x256xf32> -> vector<16x256xf32>
    %210 = arith.negf %207 : vector<16x256xf32>
    %211 = math.exp %210 : vector<16x256xf32>
    %cst_132 = arith.constant 1.000000e+00 : f32
    %212 = vector.broadcast %cst_132 : f32 to vector<16x256xf32>
    %213 = arith.addf %212, %211 : vector<16x256xf32>
    %214 = arith.divf %212, %213 : vector<16x256xf32>
    %215 = arith.mulf %207, %214 : vector<16x256xf32>
    %216 = arith.mulf %215, %209 : vector<16x256xf32>
    %217 = arith.truncf %216 : vector<16x256xf32> to vector<16x256xbf16>
    %c0_133 = arith.constant 0 : index
    %c0_134 = arith.constant 0 : index
    %218 = vector.load %arg12[%c0_133, %c0_134] : memref<256x32xbf16, #tpu.memory_space<vmem>>, vector<256x32xbf16>
    %cst_135 = arith.constant dense<0.000000e+00> : vector<16x32xf32>
    %219 = tpu.matmul %217, %218, %cst_135 {dimension_numbers = #tpu.dot_dimension_numbers<[1], [0], [0], [1], [0, 0, 1, 1], [], []>} : vector<16x256xbf16>, vector<256x32xbf16>, vector<16x32xf32> -> vector<16x32xf32>
    %220 = arith.addf %191, %219 : vector<16x32xf32>
    %c0_136 = arith.constant 0 : index
    %c0_137 = arith.constant 0 : index
    %221 = vector.load %arg16[%c0_136, %c0_137] : memref<16x32xf32, #tpu.memory_space<vmem>>, vector<16x32xf32>
    tpu.vector_store %arg16[%c0_136, %c0_137], %220 {strides = array<i32>} : memref<16x32xf32, #tpu.memory_space<vmem>>, vector<16x32xf32>,
    return
  }
  func.func @transform_0(%arg0: i32) -> (i32, i32) {
    %c0_i32 = arith.constant 0 : i32
    %c0_i32_0 = arith.constant 0 : i32
    %c0_i32_1 = arith.constant 0 : i32
    return %c0_i32, %c0_i32_0 : i32, i32
  }
  func.func @transform_1(%arg0: i32) -> (i32, i32) {
    %c0_i32 = arith.constant 0 : i32
    %c0_i32_0 = arith.constant 0 : i32
    %c0_i32_1 = arith.constant 0 : i32
    return %c0_i32, %c0_i32_0 : i32, i32
  }
  func.func @transform_2(%arg0: i32) -> (i32, i32) {
    %c0_i32 = arith.constant 0 : i32
    %c0_i32_0 = arith.constant 0 : i32
    %c0_i32_1 = arith.constant 0 : i32
    return %c0_i32, %c0_i32_0 : i32, i32
  }
  func.func @transform_3(%arg0: i32) -> (i32, i32) {
    %c0_i32 = arith.constant 0 : i32
    %c0_i32_0 = arith.constant 0 : i32
    %c0_i32_1 = arith.constant 0 : i32
    return %c0_i32, %c0_i32_0 : i32, i32
  }
  func.func @transform_4(%arg0: i32) -> (i32, i32, i32) {
    %c0_i32 = arith.constant 0 : i32
    %c0_i32_0 = arith.constant 0 : i32
    %c0_i32_1 = arith.constant 0 : i32
    %c0_i32_2 = arith.constant 0 : i32
    return %c0_i32, %c0_i32_0, %c0_i32_1 : i32, i32, i32
  }
  func.func @transform_5(%arg0: i32) -> (i32, i32, i32) {
    %c0_i32 = arith.constant 0 : i32
    %c0_i32_0 = arith.constant 0 : i32
    %c0_i32_1 = arith.constant 0 : i32
    %c0_i32_2 = arith.constant 0 : i32
    return %c0_i32, %c0_i32_0, %c0_i32_1 : i32, i32, i32
  }
  func.func @transform_6(%arg0: i32) -> (i32, i32, i32) {
    %c0_i32 = arith.constant 0 : i32
    %c0_i32_0 = arith.constant 0 : i32
    %c0_i32_1 = arith.constant 0 : i32
    %c0_i32_2 = arith.constant 0 : i32
    return %c0_i32, %c0_i32_0, %c0_i32_1 : i32, i32, i32
  }
  func.func @transform_7(%arg0: i32) -> (i32, i32, i32) {
    %c0_i32 = arith.constant 0 : i32
    %c0_i32_0 = arith.constant 0 : i32
    %c0_i32_1 = arith.constant 0 : i32
    %c0_i32_2 = arith.constant 0 : i32
    return %c0_i32, %c0_i32_0, %c0_i32_1 : i32, i32, i32
  }
  func.func @transform_8(%arg0: i32) -> (i32, i32, i32) {
    %c0_i32 = arith.constant 0 : i32
    %c0_i32_0 = arith.constant 0 : i32
    %c0_i32_1 = arith.constant 0 : i32
    %c0_i32_2 = arith.constant 0 : i32
    return %c0_i32, %c0_i32_0, %c0_i32_1 : i32, i32, i32
  }
  func.func @transform_9(%arg0: i32) -> (i32, i32, i32) {
    %c0_i32 = arith.constant 0 : i32
    %c0_i32_0 = arith.constant 0 : i32
    %c0_i32_1 = arith.constant 0 : i32
    %c0_i32_2 = arith.constant 0 : i32
    return %c0_i32, %c0_i32_0, %c0_i32_1 : i32, i32, i32
  }
  func.func @transform_10(%arg0: i32) -> (i32, i32) {
    %c0_i32 = arith.constant 0 : i32
    %c0_i32_0 = arith.constant 0 : i32
    %c0_i32_1 = arith.constant 0 : i32
    return %c0_i32, %c0_i32_0 : i32, i32
  }
  func.func @transform_11(%arg0: i32) -> (i32, i32) {
    %c0_i32 = arith.constant 0 : i32
    %c0_i32_0 = arith.constant 0 : i32
    %c0_i32_1 = arith.constant 0 : i32
    return %c0_i32, %c0_i32_0 : i32, i32
  }
  func.func @transform_12(%arg0: i32) -> (i32, i32) {
    %c0_i32 = arith.constant 0 : i32
    %c0_i32_0 = arith.constant 0 : i32
    %c0_i32_1 = arith.constant 0 : i32
    return %c0_i32, %c0_i32_0 : i32, i32
  }
  func.func @transform_13(%arg0: i32) -> (i32, i32) {
    %c0_i32 = arith.constant 0 : i32
    %c0_i32_0 = arith.constant 0 : i32
    %c0_i32_1 = arith.constant 0 : i32
    return %c0_i32, %c0_i32_0 : i32, i32
  }
  func.func @transform_14(%arg0: i32) -> (i32, i32) {
    %c0_i32 = arith.constant 0 : i32
    %c0_i32_0 = arith.constant 0 : i32
    %c0_i32_1 = arith.constant 0 : i32
    return %c0_i32, %c0_i32_0 : i32, i32
  }
  func.func @transform_15(%arg0: i32) -> (i32, i32) {
    %c0_i32 = arith.constant 0 : i32
    %c0_i32_0 = arith.constant 0 : i32
    %c0_i32_1 = arith.constant 0 : i32
    return %c0_i32, %c0_i32_0 : i32, i32
  }
}

</mosaic_0001>

<bundles_post_ra>
// kernel: tpu_custom_call.1
= control target key start
LH: loop header
LB: loop body
LE: loop exit
PB: predicated region body
PF: predicated region fallthrough
CT: control target
= control target key end

     0   :  { %vm63_vm0 = vcmask 261120   ;;  %s2625_s0 = inlined_call_operand.vmem [shape: f32[16,32], index: 0, kind: input, shape index: {}]   ;;  %s2626_s1 = inlined_call_operand.vmem [shape: f32[16,8], index: 1, kind: input, shape index: {}]   ;;  %s2627_s2 = inlined_call_operand.vmem [shape: f32[16,8], index: 2, kind: input, shape index: {}]   ;;  %s2628_s3 = inlined_call_operand.vmem [shape: f32[16,16], index: 3, kind: input, shape index: {}]   ;;  %s2629_s4 = inlined_call_operand.vmem [shape: bf16[4,32,8], index: 4, kind: input, shape index: {}]   ;;  %s2630_s5 = inlined_call_operand.vmem [shape: bf16[4,32,8], index: 5, kind: input, shape index: {}]   ;;  %s2631_s6 = inlined_call_operand.vmem [shape: bf16[4,32,8], index: 6, kind: input, shape index: {}]   ;;  %s2632_s7 = inlined_call_operand.vmem [shape: bf16[4,32,8], index: 7, kind: input, shape index: {}]   ;;  %s2633_s8 = inlined_call_operand.vmem [shape: bf16[4,32,8], index: 8, kind: input, shape index: {}]   ;;  %s2634_s9 = inlined_call_operand.vmem [shape: bf16[4,8,32], index: 9, kind: input, shape index: {}]   ;;  %s2635_s10 = inlined_call_operand.vmem [shape: bf16[32,256], index: 10, kind: input, shape index: {}]   ;;  %s2636_s11 = inlined_call_operand.vmem [shape: bf16[256,32], index: 11, kind: input, shape index: {}]   ;;  %s2637_s12 = inlined_call_operand.vmem [shape: bf16[32,256], index: 12, kind: input, shape index: {}]   ;;  %s2638_s13 = inlined_call_operand.vmem [shape: f32[1,32], index: 13, kind: input, shape index: {}]   ;;  %s2639_s14 = inlined_call_operand.vmem [shape: f32[1,32], index: 14, kind: input, shape index: {}]   ;;  %s2640_s15 = inlined_call_operand.hbm [shape: f32[16,32], index: 15, kind: output, shape index: {}]  }
   0x1   :  { %v2139_v0 = vld [vmem:[%s2625_s0] sm:$0xff] }
   0x2   :  { %v61_v1 = vmul.f32 %v2139_v0, %v2139_v0 }
   0x3   :  { %20 = vsyncpa [#allocation3], 0  ;;  %v2146_v2 = vld [vmem:[%s2625_s0 + $0x8] sm:$0xff]  ;;  %v2052_v6 = vmov 32.0   ;;  %v1898_v17 = vld [vmem:[%s2629_s4] sm:$0xff]  ;;  %vm276_vm8 = vcmask 64512  }
   0x4   :  { %v64_v3 = vsel %vm63_vm0, %v61_v1, 0.0  ;;  %v62_v4 = vmul.f32 %v2146_v2, %v2146_v2  ;;  %1968 = vrcp.f32 %v2052_v6  ;;  %v1899_v12 = vld [vmem:[%s2629_s4 + $0x8] sm:$0xff]  ;;  %v1900_v18 = vld [vmem:[%s2630_s5] sm:$0xff]  ;;  %v1911_v24 = vld [vmem:[%s2630_s5 + $0x18] sm:$0xff]  ;;  %vm297_vm9 = vcmask 130048   ;;  %s1527_s16 = sshll.u32 %s2640_s15, 4  ;;  %s1528_s16 = int_to_ptr.hbm [resolvable:$true] %s1527_s16 }
   0x5   :  { %65 = vadd.xlane.f32.xlu0 %v64_v3  ;;  %v1901_v13 = vld [vmem:[%s2630_s5 + $0x8] sm:$0xff]  ;;  %134 = vmatpush.bf16.msra.mxu2 %v1899_v12  ;;  %v1906_v19 = vld [vmem:[%s2633_s8] sm:$0xff]  ;;  %v1910_v29 = vld [vmem:[%s2630_s5 + $0x10] sm:$0xff]  ;;  %vm577_vm10 = vcmask 1043456   ;;  %s2054_s17 = smov 128  }
   0x6   :  { %v67_v5 = vsel %vm63_vm0, %v62_v4, 0.0  ;;  %v1907_v14 = vld [vmem:[%s2633_s8 + $0x8] sm:$0xff]  ;;  %164 = vmatpush.bf16.msra.mxu3 %v1901_v13  ;;  %v1902_v26 = vld [vmem:[%s2631_s6] sm:$0xff]  ;;  %v1909_v50 = vld [vmem:[%s2629_s4 + $0x18] sm:$0xff] }
   0x7   :  { %254 = vmatpush.bf16.msra.mxu0 %v1907_v14  ;;  %v1903_v22 = vld [vmem:[%s2631_s6 + $0x8] sm:$0xff]  ;;  %v1904_v27 = vld [vmem:[%s2632_s7] sm:$0xff]  ;;  %v1908_v52 = vld [vmem:[%s2629_s4 + $0x10] sm:$0xff] }
   0x8   :  { %v1905_v23 = vld [vmem:[%s2632_s7 + $0x8] sm:$0xff]  ;;  %v1966_v44 = vld [vmem:[%s2638_s13] ss:$0 sm:$0xff]  ;;  %v1917_v53 = vld [vmem:[%s2633_s8 + $0x18] sm:$0xff]  ;;  %s2055_s13 = smov 8  }
   0x9   :  { %135 = vmatpush.bf16.msra.mxu2 %v1898_v17  ;;  %v1916_v54 = vld [vmem:[%s2633_s8 + $0x10] sm:$0xff]  ;;  %v2230_v1 = vld [vmem:[%s2626_s1] sm:$0xff]  ;;  %v2242_v6 = vld [vmem:[%s2626_s1 + $0x8] sm:$0xff] }
   0xa   :  { %v1969_v7 = vpop.eup %1968  ;;  %165 = vmatpush.bf16.msra.mxu3 %v1900_v18  ;;  %v2235_v3 = vld [vmem:[%s2627_s2] sm:$0xff] }
   0xb   :  { %v71_v8 = vmul.f32 32.0, %v1969_v7  ;;  %vm75_vm1 = vweird.f32 %v1969_v7  ;;  %255 = vmatpush.bf16.msra.mxu0 %v1906_v19  ;;  %v1913_v19 = vld [vmem:[%s2631_s6 + $0x18] sm:$0xff] }
   0xd   :  { %68 = vadd.xlane.f32.xlu0 %v67_v5  ;;  %v72_v9 = vsub.f32 1.0, %v71_v8  ;;  %194 = vmatpush.bf16.msrb.mxu2 %v1903_v22 }
   0xe   :  { %224 = vmatpush.bf16.msrb.mxu3 %v1905_v23 }
   0xf   :  { %v73_v10 = vmul.f32 %v1969_v7, %v72_v9  ;;  %395 = vmatpush.bf16.msrb.mxu0 %v1911_v24 }
  0x11   :  { %v74_v11 = vadd.f32 %v1969_v7, %v73_v10  ;;  %195 = vmatpush.bf16.msrb.mxu2 %v1902_v26 }
  0x12   :  { %225 = vmatpush.bf16.msrb.mxu3 %v1904_v27 }
  0x13   :  { %v2161_v15 = vsel %vm75_vm1, %v1969_v7, %v74_v11  ;;  %396 = vmatpush.bf16.msrb.mxu0 %v1910_v29  ;;  %v2247_v7 = vld [vmem:[%s2627_s2 + $0x8] sm:$0xff] }
  0x78   :  { %v66_v16 = vpop.xlane.xlu0 %65 }
  0x79   :  { %v77_v20 = vmul.f32 %v2161_v15, %v66_v16 }
  0x7b   :  { %v79_v21 = vadd.f32 1e-06, %v77_v20 }
  0x7d   :  { %1970 = vrsqrt.f32 %v79_v21  ;;  %vm87_vm3 = vweird.f32 %v79_v21 }
  0x80   :  { %v69_v25 = vpop.xlane.xlu0 %68 }
  0x81   :  { %v78_v28 = vmul.f32 %v2161_v15, %v69_v25  ;;  %v1912_v25 = vld [vmem:[%s2631_s6 + $0x10] sm:$0xff] }
  0x83   :  { %v1971_v30 = vpop.eup %1970  ;;  %v80_v31 = vadd.f32 1e-06, %v78_v28 }
  0x84   :  { %v82_v32 = vmul.f32 %v1971_v30, %v79_v21  ;;  %vm88_vm2 = vweird.f32 %v1971_v30 }
  0x85   :  { %1972 = vrsqrt.f32 %v80_v31  ;;  %vm89_vm4 = vmor %vm87_vm3, %vm88_vm2  ;;  %vm97_vm6 = vweird.f32 %v80_v31 }
  0x86   :  { %v83_v33 = vmul.f32 %v1971_v30, %v82_v32 }
  0x88   :  { %v84_v34 = vmul.f32 0.5, %v83_v33 }
  0x8a   :  { %v85_v35 = vsub.f32 1.5, %v84_v34 }
  0x8b   :  { %v1973_v36 = vpop.eup %1972 }
  0x8c   :  { %v92_v37 = vmul.f32 %v1973_v36, %v80_v31  ;;  %v86_v38 = vmul.f32 %v1971_v30, %v85_v35  ;;  %vm98_vm5 = vweird.f32 %v1973_v36 }
  0x8d   :  { %vm99_vm7 = vmor %vm97_vm6, %vm98_vm5 }
  0x8e   :  { %v93_v39 = vmul.f32 %v1973_v36, %v92_v37  ;;  %v90_v41 = vsel %vm89_vm4, %v1971_v30, %v86_v38 }
  0x8f   :  { %v101_v45 = vmul.f32 %v90_v41, %v2139_v0 }
  0x90   :  { %v94_v40 = vmul.f32 0.5, %v93_v39 }
  0x91   :  { %v106_v48 = vmul.f32 %v1966_v44, %v101_v45 }
  0x92   :  { %v95_v42 = vsub.f32 1.5, %v94_v40  ;;  %v2278_v40 = vld [vmem:[%s2628_s3] sm:$0xff] }
  0x94   :  { %v96_v43 = vmul.f32 %v1973_v36, %v95_v42 }
  0x96   :  { %v100_v46 = vsel %vm99_vm7, %v1973_v36, %v96_v43 }
  0x97   :  { %v102_v47 = vmul.f32 %v100_v46, %v2146_v2 }
  0x99   :  { %v107_v49 = vmul.f32 %v1966_v44, %v102_v47  ;;  %v2285_v44 = vld [vmem:[%s2628_s3 + $0x8] sm:$0xff] }
  0x9b   :  { %v2200_v51 = vpack.c.bf16 %v107_v49, %v106_v48 }
  0x9d   :  { %1547 = vmatmul.msk.bf16.vlgmr.msra.gmra.mxu2 %vm63_vm0, %v2200_v51  ;;  %1556 = vmatmul.msk.bf16.vlgmr.msra.gmra.mxu3 %vm63_vm0, %v2200_v51 }
  0x9e   :  { %1583 = vmatmul.msk.bf16.vlgmr.msra.gmra.mxu0 %vm63_vm0, %v2200_v51  ;;  %364 = vmatpush.bf16.msra.mxu3 %v1909_v50 }
  0xa2   :  { %365 = vmatpush.bf16.msra.mxu3 %v1908_v52 }
  0xad   :  { %1565 = vmatmul.msk.bf16.vlgmr.msrb.gmra.mxu2 %vm63_vm0, %v2200_v51  ;;  %1574 = vmatmul.msk.bf16.vlgmr.msrb.gmra.mxu3 %vm63_vm0, %v2200_v51 }
  0xae   :  { %1611 = vmatmul.msk.bf16.vlgmr.msrb.gmra.mxu0 %vm63_vm0, %v2200_v51  ;;  %488 = vmatpush.bf16.msrb.mxu3 %v1917_v53 }
  0xb2   :  { %489 = vmatpush.bf16.msrb.mxu3 %v1916_v54 }
  0xbd   :  { %1598 = vmatmul.msk.bf16.vlgmr.msra.gmra.mxu3 %vm63_vm0, %v2200_v51 }
  0xcd   :  { %1650 = vmatmul.msk.bf16.vlgmr.msrb.gmra.mxu3 %vm63_vm0, %v2200_v51 }
 0x11b   :  { %v257_v55 = vpop.f32.mrf.mxu0 }
 0x120   :  { %v137_v56 = vpop.f32.mrf.mxu2  ;;  %v167_v57 = vpop.f32.mrf.mxu3 }
 0x121   :  { %v262_v20 = vmul.f32 %v137_v56, %v2230_v1  ;;  %v264_v21 = vmul.f32 %v167_v57, %v2235_v3 }
 0x123   :  { %v259_v58 = vpop.f32.mrf.mxu0  ;;  %v266_v26 = vadd.f32 %v264_v21, %v262_v20 }
 0x124   :  { %v321_v59 = vpack.c.bf16 %v259_v58, %v257_v55 }
 0x126   :  { %332 = vmatpush.bf16.msra.mxu2 %v321_v59  ;;  %v1915_v59 = vld [vmem:[%s2632_s7 + $0x18] sm:$0xff] }
 0x128   :  { %v139_v60 = vpop.f32.mrf.mxu2  ;;  %v169_v61 = vpop.f32.mrf.mxu3 }
 0x129   :  { %v263_v16 = vmul.f32 %v139_v60, %v2242_v6  ;;  %v265_v17 = vmul.f32 %v169_v61, %v2247_v7  ;;  %v1914_v60 = vld [vmem:[%s2632_s7 + $0x10] sm:$0xff] }
 0x12a   :  { %457 = vmatpush.bf16.msrb.mxu2 %v1915_v59 }
 0x12b   :  { %v398_v14 = vpop.f32.mrf.mxu0  ;;  %v267_v24 = vadd.f32 %v265_v17, %v263_v16 }
 0x12c   :  { %v498_v31 = vmul.f32 %v398_v14, %v2235_v3 }
 0x12d   :  { %v274_v27 = vpack.c.bf16 %v267_v24, %v266_v26 }
 0x12e   :  { %458 = vmatpush.bf16.msrb.mxu2 %v1914_v60 }
 0x130   :  { %v197_v62 = vpop.f32.mrf.mxu2  ;;  %v227_v63 = vpop.f32.mrf.mxu3 }
 0x131   :  { %v268_v4 = vmul.f32 %v197_v62, %v2230_v1  ;;  %v270_v5 = vmul.f32 %v227_v63, %v2235_v3 }
 0x133   :  { %v272_v12 = vadd.f32 %v270_v5, %v268_v4  ;;  %v400_v28 = vpop.f32.mrf.mxu0 }
 0x134   :  { %v499_v32 = vmul.f32 %v400_v28, %v2247_v7 }
 0x138   :  { %v199_v8 = vpop.f32.mrf.mxu2  ;;  %v229_v9 = vpop.f32.mrf.mxu3 }
 0x139   :  { %v269_v10 = vmul.f32 %v199_v8, %v2242_v6  ;;  %v271_v11 = vmul.f32 %v229_v9, %v2247_v7 }
 0x13b   :  { %v273_v13 = vadd.f32 %v271_v11, %v269_v10  ;;  %v340_v10 = vld [vmem:[%s2634_s9] sm:$0xf] }
 0x13c   :  { %v599_v11 = vsel %vm577_vm10, %v340_v10, 0 }
 0x13d   :  { %v275_v18 = vpack.c.bf16 %v273_v13, %v272_v12  ;;  %608 = vmatpush.bf16.msra.mxu3 %v599_v11  ;;  %v1925_v12 = vld [vmem:[%s2632_s7 + $0x28] sm:$0xff]  ;;  %v1924_v13 = vld [vmem:[%s2632_s7 + $0x20] sm:$0xff] }
 0x13f   :  { %v281_v22 = vsel %vm276_vm8, %v275_v18, 0 }
 0x140   :  { %290 = vmatpush.bf16.xpose.msra.mxu1 %v281_v22  ;;  %v367_v23 = vpop.f32.mrf.mxu3 }
 0x141   :  { %v496_v29 = vmul.f32 %v367_v23, %v2230_v1  ;;  %731 = vmatpush.bf16.msrb.mxu3 %v1925_v12  ;;  %v1922_v12 = vld [vmem:[%s2631_s6 + $0x20] sm:$0xff] }
 0x143   :  { %v2267_v34 = vadd.f32 %v498_v31, %v496_v29  ;;  %v1919_v29 = vld [vmem:[%s2629_s4 + $0x28] sm:$0xff]  ;;  %v1918_v31 = vld [vmem:[%s2629_s4 + $0x20] sm:$0xff] }
 0x145   :  { %732 = vmatpush.bf16.msrb.mxu3 %v1924_v13 }
 0x147   :  { %1584 = vmatmul.msk.bf16.vlgmr.msra.gmra.mxu1 %vm276_vm8, %v274_v27 }
 0x148   :  { %426 = vmatpush.bf16.msrb.mxu1 %v1913_v19  ;;  %v369_v30 = vpop.f32.mrf.mxu3 }
 0x149   :  { %v497_v33 = vmul.f32 %v369_v30, %v2242_v6 }
 0x14b   :  { %v2269_v35 = vadd.f32 %v499_v32, %v497_v33  ;;  %v1927_v32 = vld [vmem:[%s2633_s8 + $0x28] sm:$0xff]  ;;  %v1926_v33 = vld [vmem:[%s2633_s8 + $0x20] sm:$0xff] }
 0x14c   :  { %427 = vmatpush.bf16.msrb.mxu1 %v1912_v25 }
 0x14d   :  { %v508_v36 = vpack.c.bf16 %v2269_v35, %v2267_v34  ;;  %v1928_v34 = vld [vmem:[%s2629_s4 + $0x30] sm:$0xff]  ;;  %v1937_v35 = vld [vmem:[%s2633_s8 + $0x38] sm:$0xff] }
 0x150   :  { %v491_v37 = vpop.f32.mrf.mxu3 }
 0x157   :  { %1624 = vmatmul.msk.bf16.vlgmr.msrb.gmra.mxu1 %vm63_vm0, %v2200_v51 }
 0x158   :  { %v493_v38 = vpop.f32.mrf.mxu3 }
 0x159   :  { %v553_v39 = vpack.c.bf16 %v493_v38, %v491_v37  ;;  %v1929_v37 = vld [vmem:[%s2629_s4 + $0x38] sm:$0xff] }
 0x15b   :  { %564 = vmatpush.bf16.msra.mxu1 %v553_v39 }
 0x1c4   :  { %v292_v41 = vpop.f32.mrf.mxu1 }
 0x1c5   :  { %v293_v42 = vadd.f32 %v292_v41, %v2278_v40 }
 0x1c7   :  { %v298_v43 = vsel %vm297_vm9, %v293_v42, -inf }
 0x1c8   :  { %299 = vmax.xlane.f32.xlu1 %v298_v43 }
 0x1cc   :  { %v294_v45 = vpop.f32.mrf.mxu1 }
 0x1cd   :  { %v295_v46 = vadd.f32 %v294_v45, %v2285_v44 }
 0x1cf   :  { %v301_v47 = vsel %vm297_vm9, %v295_v46, -inf }
 0x1d0   :  { %302 = vmax.xlane.f32.xlu1 %v301_v47 }
 0x1d4   :  { %v429_v18 = vpop.f32.mrf.mxu1 }
 0x1d5   :  { %v502_v23 = vmul.f32 %v429_v18, %v2230_v1 }
 0x1dc   :  { %v431_v20 = vpop.f32.mrf.mxu1 }
 0x1dd   :  { %v503_v24 = vmul.f32 %v431_v20, %v2242_v6 }
 0x23b   :  { %v300_v48 = vpop.xlane.xlu1 %299 }
 0x23c   :  { %v304_v49 = vsub.f32 %v293_v42, %v300_v48 }
 0x23e   :  { %v306_v50 = vmul.f32 1.442695, %v304_v49 }
 0x240   :  { %1974 = vpow2.f32 %v306_v50 }
 0x243   :  { %v303_v52 = vpop.xlane.xlu1 %302 }
 0x244   :  { %v305_v53 = vsub.f32 %v295_v46, %v303_v52 }
 0x246   :  { %v1975_v54 = vpop.eup %1974  ;;  %v308_v55 = vmul.f32 1.442695, %v305_v53 }
 0x247   :  { %v310_v56 = vsel %vm297_vm9, %v1975_v54, 0.0 }
 0x248   :  { %1976 = vpow2.f32 %v308_v55  ;;  %311 = vadd.xlane.f32.xlu2 %v310_v56 }
 0x24e   :  { %v1977_v57 = vpop.eup %1976 }
 0x24f   :  { %v313_v58 = vsel %vm297_vm9, %v1977_v57, 0.0 }
 0x250   :  { %314 = vadd.xlane.f32.xlu2 %v313_v58  ;;  %v1920_v58 = vld [vmem:[%s2630_s5 + $0x20] sm:$0xff] }
 0x2bb   :  { %v312_v61 = vpop.xlane.xlu2 %311 }
 0x2bc   :  { %1978 = vrcp.f32 %v312_v61 }
 0x2c2   :  { %v1979_v63 = vpop.eup %1978 }
 0x2c3   :  { %v315_v62 = vpop.xlane.xlu2 %314  ;;  %v318_v5 = vmul.f32 %v1979_v63, %v1975_v54 }
 0x2c4   :  { %1980 = vrcp.f32 %v315_v62 }
 0x2ca   :  { %v1981_v4 = vpop.eup %1980 }
 0x2cb   :  { %v319_v8 = vmul.f32 %v1981_v4, %v1977_v57  ;;  %v1921_v57 = vld [vmem:[%s2630_s5 + $0x28] sm:$0xff] }
 0x2cc   :  { %669 = vmatpush.bf16.msrb.mxu1 %v1921_v57 }
 0x2cd   :  { %v320_v9 = vpack.c.bf16 %v319_v8, %v318_v5  ;;  %v1653_v8 = vld [vmem:[%s2634_s9 + $0x4] sm:$0xf] }
 0x2ce   :  { %v579_v10 = vsel %vm577_vm10, %v1653_v8, 0 }
 0x2cf   :  { %1585 = vmatmul.msk.bf16.vlgmr.msra.gmra.mxu2 %vm297_vm9, %v320_v9  ;;  %v1923_v9 = vld [vmem:[%s2631_s6 + $0x28] sm:$0xff] }
 0x2d0   :  { %670 = vmatpush.bf16.msrb.mxu1 %v1920_v58  ;;  %588 = vmatpush.bf16.msra.mxu2 %v579_v10 }
 0x2df   :  { %1637 = vmatmul.msk.bf16.vlgmr.msrb.gmra.mxu2 %vm63_vm0, %v2200_v51 }
 0x2e0   :  { %700 = vmatpush.bf16.msrb.mxu2 %v1923_v9 }
 0x2e4   :  { %701 = vmatpush.bf16.msrb.mxu2 %v1922_v12 }
 0x352   :  { %v334_v14 = vpop.f32.mrf.mxu2 }
 0x35a   :  { %v336_v16 = vpop.f32.mrf.mxu2 }
 0x35b   :  { %v339_v17 = vpack.c.bf16 %v336_v16, %v334_v14 }
 0x35d   :  { %1655 = vmatmul.msk.bf16.vlgmr.msra.gmra.mxu3 %vm276_vm8, %v339_v17 }
 0x362   :  { %v460_v19 = vpop.f32.mrf.mxu2 }
 0x363   :  { %v504_v21 = vmul.f32 %v460_v19, %v2235_v3 }
 0x365   :  { %v506_v26 = vadd.f32 %v504_v21, %v502_v23 }
 0x36a   :  { %v462_v22 = vpop.f32.mrf.mxu2 }
 0x36b   :  { %v505_v25 = vmul.f32 %v462_v22, %v2247_v7 }
 0x36d   :  { %v507_v27 = vadd.f32 %v505_v25, %v503_v24  ;;  %1707 = vmatmul.msk.bf16.vlgmr.msrb.gmra.mxu3 %vm63_vm0, %v2200_v51 }
 0x36f   :  { %v509_v28 = vpack.c.bf16 %v507_v27, %v506_v26 }
 0x371   :  { %v514_v30 = vsel %vm276_vm8, %v509_v28, 0 }
 0x372   :  { %523 = vmatpush.bf16.xpose.msra.mxu0 %v514_v30 }
 0x379   :  { %1651 = vmatmul.msk.bf16.vlgmr.msra.gmra.mxu0 %vm276_vm8, %v508_v36  ;;  %v1936_v36 = vld [vmem:[%s2633_s8 + $0x30] sm:$0xff] }
 0x37a   :  { %638 = vmatpush.bf16.msrb.mxu0 %v1919_v29 }
 0x37e   :  { %639 = vmatpush.bf16.msrb.mxu0 %v1918_v31 }
 0x382   :  { %762 = vmatpush.bf16.msra.mxu0 %v1927_v32 }
 0x386   :  { %763 = vmatpush.bf16.msra.mxu0 %v1926_v33 }
 0x389   :  { %1668 = vmatmul.msk.bf16.vlgmr.msrb.gmra.mxu0 %vm63_vm0, %v2200_v51 }
 0x38a   :  { %893 = vmatpush.bf16.msrb.mxu0 %v1929_v37 }
 0x38e   :  { %894 = vmatpush.bf16.msrb.mxu0 %v1928_v34 }
 0x399   :  { %1720 = vmatmul.msk.bf16.vlgmr.msra.gmra.mxu0 %vm63_vm0, %v2200_v51 }
 0x39a   :  { %1017 = vmatpush.bf16.msra.mxu0 %v1937_v35 }
 0x39e   :  { %1018 = vmatpush.bf16.msra.mxu0 %v1936_v36 }
 0x3a9   :  { %1737 = vmatmul.msk.bf16.vlgmr.msrb.gmra.mxu0 %vm63_vm0, %v2200_v51 }
 0x3b9   :  { %1789 = vmatmul.msk.bf16.vlgmr.msra.gmra.mxu0 %vm63_vm0, %v2200_v51 }
 0x3e0   :  { %v2386_v30 = vpop.f32.mrf.mxu3 }
 0x3e8   :  { %v2390_v32 = vpop.f32.mrf.mxu3 }
 0x3f0   :  { %v734_v37 = vpop.f32.mrf.mxu3 }
 0x3f6   :  { %v525_v38 = vpop.f32.mrf.mxu0 }
 0x3f7   :  { %v526_v39 = vadd.f32 %v525_v38, %v2278_v40 }
 0x3f8   :  { %v736_v35 = vpop.f32.mrf.mxu3 }
 0x3f9   :  { %v530_v41 = vsel %vm297_vm9, %v526_v39, -inf }
 0x3fa   :  { %531 = vmax.xlane.f32.xlu0 %v530_v41  ;;  %v779_v41 = vmul.f32 %v736_v35, %v2247_v7 }
 0x3fe   :  { %v527_v42 = vpop.f32.mrf.mxu0 }
 0x3ff   :  { %v528_v43 = vadd.f32 %v527_v42, %v2285_v44 }
 0x401   :  { %v533_v45 = vsel %vm297_vm9, %v528_v43, -inf }
 0x402   :  { %534 = vmax.xlane.f32.xlu1 %v533_v45 }
 0x406   :  { %v641_v11 = vpop.f32.mrf.mxu0 }
 0x407   :  { %v770_v24 = vmul.f32 %v641_v11, %v2230_v1 }
 0x40e   :  { %v643_v13 = vpop.f32.mrf.mxu0 }
 0x40f   :  { %v771_v25 = vmul.f32 %v643_v13, %v2242_v6 }
 0x416   :  { %v765_v14 = vpop.f32.mrf.mxu0 }
 0x41e   :  { %v767_v17 = vpop.f32.mrf.mxu0 }
 0x41f   :  { %v827_v20 = vpack.c.bf16 %v767_v17, %v765_v14 }
 0x426   :  { %v896_v57 = vpop.f32.mrf.mxu0 }
 0x46d   :  { %v532_v46 = vpop.xlane.xlu0 %531 }
 0x46e   :  { %v536_v47 = vsub.f32 %v526_v39, %v532_v46  ;;  %v778_v39 = vmul.f32 %v734_v37, %v2235_v3 }
 0x470   :  { %v538_v48 = vmul.f32 1.442695, %v536_v47  ;;  %v1931_v47 = vld [vmem:[%s2630_s5 + $0x38] sm:$0xff] }
 0x472   :  { %1982 = vpow2.f32 %v538_v48 }
 0x475   :  { %v535_v49 = vpop.xlane.xlu1 %534 }
 0x476   :  { %v537_v50 = vsub.f32 %v528_v43, %v535_v49  ;;  %v1930_v49 = vld [vmem:[%s2630_s5 + $0x30] sm:$0xff] }
 0x478   :  { %v1983_v52 = vpop.eup %1982  ;;  %v540_v53 = vmul.f32 1.442695, %v537_v50 }
 0x479   :  { %v542_v54 = vsel %vm297_vm9, %v1983_v52, 0.0 }
 0x47a   :  { %1984 = vpow2.f32 %v540_v53  ;;  %543 = vadd.xlane.f32.xlu2 %v542_v54 }
 0x480   :  { %v1985_v55 = vpop.eup %1984 }
 0x481   :  { %v545_v56 = vsel %vm297_vm9, %v1985_v55, 0.0 }
 0x482   :  { %546 = vadd.xlane.f32.xlu0 %v545_v56 }
 0x4ed   :  { %v544_v59 = vpop.xlane.xlu2 %543 }
 0x4ee   :  { %1986 = vrcp.f32 %v544_v59  ;;  %v898_v59 = vpop.f32.mrf.mxu0 }
 0x4f4   :  { %v1987_v61 = vpop.eup %1986 }
 0x4f5   :  { %v547_v60 = vpop.xlane.xlu0 %546  ;;  %v550_v63 = vmul.f32 %v1987_v61, %v1983_v52 }
 0x4f6   :  { %1988 = vrcp.f32 %v547_v60 }
 0x4fc   :  { %v1989_v62 = vpop.eup %1988 }
 0x4fd   :  { %v551_v4 = vmul.f32 %v1989_v62, %v1985_v55  ;;  %v1025_v62 = vmul.f32 %v896_v57, %v2230_v1 }
 0x4ff   :  { %v552_v5 = vpack.c.bf16 %v551_v4, %v550_v63  ;;  %v1026_v63 = vmul.f32 %v898_v59, %v2242_v6 }
 0x501   :  { %1652 = vmatmul.msk.bf16.vlgmr.msra.gmra.mxu1 %vm297_vm9, %v552_v5 }
 0x511   :  { %1681 = vmatmul.msk.bf16.vlgmr.msrb.gmra.mxu1 %vm63_vm0, %v2200_v51 }
 0x57e   :  { %v566_v16 = vpop.f32.mrf.mxu1 }
 0x586   :  { %v568_v18 = vpop.f32.mrf.mxu1 }
 0x587   :  { %v571_v19 = vpack.c.bf16 %v568_v18, %v566_v16 }
 0x589   :  { %1654 = vmatmul.msk.bf16.vlgmr.msra.gmra.mxu2 %vm276_vm8, %v571_v19 }
 0x58a   :  { %838 = vmatpush.bf16.msra.mxu2 %v827_v20 }
 0x58e   :  { %v672_v21 = vpop.f32.mrf.mxu1 }
 0x58f   :  { %v772_v22 = vmul.f32 %v672_v21, %v2235_v3  ;;  %v1933_v21 = vld [vmem:[%s2631_s6 + $0x38] sm:$0xff] }
 0x591   :  { %v774_v27 = vadd.f32 %v772_v22, %v770_v24  ;;  %v1932_v22 = vld [vmem:[%s2631_s6 + $0x30] sm:$0xff]  ;;  %v1020_v24 = vpop.f32.mrf.mxu0 }
 0x596   :  { %v674_v23 = vpop.f32.mrf.mxu1 }
 0x597   :  { %v773_v26 = vmul.f32 %v674_v23, %v2247_v7 }
 0x599   :  { %v775_v28 = vadd.f32 %v773_v26, %v771_v25  ;;  %1694 = vmatmul.msk.bf16.vlgmr.msrb.gmra.mxu2 %vm63_vm0, %v2200_v51 }
 0x59a   :  { %955 = vmatpush.bf16.msrb.mxu2 %v1933_v21 }
 0x59b   :  { %v782_v29 = vpack.c.bf16 %v775_v28, %v774_v27  ;;  %v1022_v28 = vpop.f32.mrf.mxu0 }
 0x59c   :  { %v1082_v35 = vpack.c.bf16 %v1022_v28, %v1020_v24 }
 0x59e   :  { %956 = vmatpush.bf16.msrb.mxu2 %v1932_v22 }
 0x60c   :  { %v2388_v31 = vpop.f32.mrf.mxu2 }
 0x614   :  { %v2392_v33 = vpop.f32.mrf.mxu2 }
 0x61c   :  { %v703_v34 = vpop.f32.mrf.mxu2 }
 0x61d   :  { %v776_v36 = vmul.f32 %v703_v34, %v2230_v1 }
 0x61f   :  { %v780_v43 = vadd.f32 %v778_v39, %v776_v36  ;;  %v1723_v36 = vld [vmem:[%s2634_s9 + $0x8] sm:$0xf]  ;;  %v1935_v39 = vld [vmem:[%s2632_s7 + $0x38] sm:$0xff] }
 0x624   :  { %v705_v38 = vpop.f32.mrf.mxu2 }
 0x625   :  { %v777_v42 = vmul.f32 %v705_v38, %v2242_v6  ;;  %v852_v38 = vsel %vm577_vm10, %v1723_v36, 0 }
 0x626   :  { %861 = vmatpush.bf16.msra.mxu3 %v852_v38 }
 0x627   :  { %v781_v45 = vadd.f32 %v779_v41, %v777_v42  ;;  %v1934_v41 = vld [vmem:[%s2632_s7 + $0x30] sm:$0xff] }
 0x629   :  { %v783_v46 = vpack.c.bf16 %v781_v45, %v780_v43 }
 0x62a   :  { %986 = vmatpush.bf16.msrb.mxu3 %v1935_v39  ;;  %v1941_v39 = vld [vmem:[%s2635_s10 + $0x14] sm:$0xf0] }
 0x62b   :  { %v788_v48 = vsel %vm276_vm8, %v783_v46, 0  ;;  %v611_v46 = vadd.f32 %v2386_v30, %v2388_v31 }
 0x62c   :  { %797 = vmatpush.bf16.xpose.msra.mxu1 %v788_v48 }
 0x62e   :  { %987 = vmatpush.bf16.msrb.mxu3 %v1934_v41  ;;  %v1940_v41 = vld [vmem:[%s2635_s10 + $0x14] sm:$0xf] }
 0x633   :  { %1721 = vmatmul.msk.bf16.vlgmr.msra.gmra.mxu1 %vm276_vm8, %v782_v29 }
 0x634   :  { %924 = vmatpush.bf16.msrb.mxu1 %v1931_v47 }
 0x638   :  { %925 = vmatpush.bf16.msrb.mxu1 %v1930_v49  ;;  %v613_v49 = vadd.f32 %v2390_v32, %v2392_v33 }
 0x643   :  { %1750 = vmatmul.msk.bf16.vlgmr.msrb.gmra.mxu1 %vm63_vm0, %v2200_v51 }
 0x6b0   :  { %v799_v50 = vpop.f32.mrf.mxu1 }
 0x6b1   :  { %v800_v52 = vadd.f32 %v799_v50, %v2278_v40 }
 0x6b3   :  { %v804_v53 = vsel %vm297_vm9, %v800_v52, -inf }
 0x6b4   :  { %805 = vmax.xlane.f32.xlu1 %v804_v53 }
 0x6b8   :  { %v801_v54 = vpop.f32.mrf.mxu1 }
 0x6b9   :  { %v802_v55 = vadd.f32 %v801_v54, %v2285_v44 }
 0x6bb   :  { %v807_v56 = vsel %vm297_vm9, %v802_v55, -inf }
 0x6bc   :  { %808 = vmax.xlane.f32.xlu2 %v807_v56 }
 0x6c0   :  { %v927_v58 = vpop.f32.mrf.mxu1 }
 0x6c1   :  { %v1027_v60 = vmul.f32 %v927_v58, %v2235_v3 }
 0x6c3   :  { %v2416_v5 = vadd.f32 %v1027_v60, %v1025_v62 }
 0x6c8   :  { %v929_v61 = vpop.f32.mrf.mxu1 }
 0x6c9   :  { %v1028_v4 = vmul.f32 %v929_v61, %v2247_v7 }
 0x6cb   :  { %v2418_v8 = vadd.f32 %v1028_v4, %v1026_v63 }
 0x6cd   :  { %v1037_v9 = vpack.c.bf16 %v2418_v8, %v2416_v5 }
 0x727   :  { %v806_v10 = vpop.xlane.xlu1 %805 }
 0x728   :  { %v810_v11 = vsub.f32 %v800_v52, %v806_v10 }
 0x72a   :  { %v812_v12 = vmul.f32 1.442695, %v810_v11 }
 0x72c   :  { %1990 = vpow2.f32 %v812_v12 }
 0x72f   :  { %v809_v13 = vpop.xlane.xlu2 %808 }
 0x730   :  { %v811_v14 = vsub.f32 %v802_v55, %v809_v13 }
 0x732   :  { %v1991_v16 = vpop.eup %1990  ;;  %v814_v17 = vmul.f32 1.442695, %v811_v14 }
 0x733   :  { %v816_v18 = vsel %vm297_vm9, %v1991_v16, 0.0 }
 0x734   :  { %1992 = vpow2.f32 %v814_v17  ;;  %817 = vadd.xlane.f32.xlu0 %v816_v18 }
 0x73a   :  { %v1993_v19 = vpop.eup %1992 }
 0x73b   :  { %v819_v20 = vsel %vm297_vm9, %v1993_v19, 0.0 }
 0x73c   :  { %820 = vadd.xlane.f32.xlu1 %v819_v20  ;;  %v1792_v20 = vld [vmem:[%s2634_s9 + $0xc] sm:$0xf] }
 0x73d   :  { %v1107_v21 = vsel %vm577_vm10, %v1792_v20, 0 }
 0x7a7   :  { %v818_v23 = vpop.xlane.xlu0 %817 }
 0x7a8   :  { %1994 = vrcp.f32 %v818_v23 }
 0x7ae   :  { %v1995_v26 = vpop.eup %1994 }
 0x7af   :  { %v821_v25 = vpop.xlane.xlu1 %820  ;;  %v824_v29 = vmul.f32 %v1995_v26, %v1991_v16 }
 0x7b0   :  { %1996 = vrcp.f32 %v821_v25 }
 0x7b6   :  { %v1997_v27 = vpop.eup %1996 }
 0x7b7   :  { %v825_v37 = vmul.f32 %v1997_v27, %v1993_v19 }
 0x7b9   :  { %v826_v34 = vpack.c.bf16 %v825_v37, %v824_v29 }
 0x7bb   :  { %1722 = vmatmul.msk.bf16.vlgmr.msra.gmra.mxu2 %vm297_vm9, %v826_v34 }
 0x7bc   :  { %1093 = vmatpush.bf16.msra.mxu2 %v1082_v35 }
 0x7cb   :  { %1763 = vmatmul.msk.bf16.vlgmr.msrb.gmra.mxu2 %vm63_vm0, %v2200_v51 }
 0x83e   :  { %v840_v42 = vpop.f32.mrf.mxu2 }
 0x846   :  { %v842_v43 = vpop.f32.mrf.mxu2 }
 0x847   :  { %v845_v45 = vpack.c.bf16 %v842_v43, %v840_v42  ;;  %v1806_v42 = vld [vmem:[%s2635_s10 + $0x18] sm:$0xf0]  ;;  %v1822_v43 = vld [vmem:[%s2637_s12 + $0x10] sm:$0xf] }
 0x849   :  { %1724 = vmatmul.msk.bf16.vlgmr.msra.gmra.mxu3 %vm276_vm8, %v845_v45  ;;  %v1945_v45 = vld [vmem:[%s2637_s12 + $0x14] sm:$0xf0] }
 0x84a   :  { %1116 = vmatpush.bf16.msra.mxu3 %v1107_v21  ;;  %v1953_v21 = vld [vmem:[%s2636_s11 + $0x38] sm:$0xff] }
 0x84e   :  { %v958_v53 = vpop.f32.mrf.mxu2 }
 0x84f   :  { %v1031_v58 = vmul.f32 %v958_v53, %v2230_v1  ;;  %v1796_v53 = vld [vmem:[%s2635_s10] sm:$0xf] }
 0x856   :  { %v960_v55 = vpop.f32.mrf.mxu2 }
 0x859   :  { %1776 = vmatmul.msk.bf16.vlgmr.msrb.gmra.mxu3 %vm63_vm0, %v2200_v51  ;;  %v1032_v51 = vmul.f32 %v960_v55, %v2242_v6  ;;  %v1938_v55 = vld [vmem:[%s2635_s10 + $0x4] sm:$0xf] }
 0x8cc   :  { %v863_v47 = vpop.f32.mrf.mxu3 }
 0x8cd   :  { %v868_v48 = vadd.f32 %v863_v47, %v611_v46  ;;  %v1809_v46 = vor.u32 %v1940_v41, %v1806_v42  ;;  %v1823_v47 = vor.u32 %v1945_v45, %v1822_v43  ;;  %v1948_v41 = vld [vmem:[%s2636_s11 + $0x10] sm:$0xff]  ;;  %v1947_v42 = vld [vmem:[%s2636_s11 + $0x8] sm:$0xff] }
 0x8ce   :  { %v1955_v43 = vld [vmem:[%s2636_s11 + $0x48] sm:$0xff] }
 0x8cf   :  { %1253 = vmatpush.bf16.msrb.mxu2 %v1823_v47 }
 0x8d4   :  { %v865_v50 = vpop.f32.mrf.mxu3 }
 0x8d5   :  { %v869_v52 = vadd.f32 %v865_v50, %v613_v49  ;;  %v1824_v49 = vld [vmem:[%s2637_s12 + $0x18] sm:$0xf0] }
 0x8dc   :  { %v989_v54 = vpop.f32.mrf.mxu3 }
 0x8dd   :  { %v1033_v56 = vmul.f32 %v989_v54, %v2235_v3  ;;  %v1939_v54 = vld [vmem:[%s2635_s10 + $0x4] sm:$0xf0] }
 0x8df   :  { %v1035_v30 = vadd.f32 %v1033_v56, %v1031_v58  ;;  %v1798_v58 = vld [vmem:[%s2635_s10 + $0x8] sm:$0xf0] }
 0x8e4   :  { %v991_v57 = vpop.f32.mrf.mxu3 }
 0x8e5   :  { %v1034_v59 = vmul.f32 %v991_v57, %v2247_v7  ;;  %v1797_v57 = vor.u32 %v1939_v54, %v1796_v53  ;;  %v1946_v53 = vld [vmem:[%s2636_s11] sm:$0xff] }
 0x8e6   :  { %v1954_v54 = vld [vmem:[%s2636_s11 + $0x40] sm:$0xff] }
 0x8e7   :  { %v1036_v31 = vadd.f32 %v1034_v59, %v1032_v51  ;;  %v1814_v51 = vld [vmem:[%s2637_s12] sm:$0xf]  ;;  %v1943_v59 = vld [vmem:[%s2637_s12 + $0x4] sm:$0xf0] }
 0x8e9   :  { %v1038_v60 = vpack.c.bf16 %v1036_v31, %v1035_v30  ;;  %v1801_v30 = vor.u32 %v1938_v55, %v1798_v58  ;;  %v1815_v31 = vor.u32 %v1943_v59, %v1814_v51 }
 0x8eb   :  { %v1043_v61 = vsel %vm276_vm8, %v1038_v60, 0  ;;  %v1942_v60 = vld [vmem:[%s2637_s12 + $0x4] sm:$0xf]  ;;  %1254 = vmatpush.bf16.msrb.mxu2 %v1815_v31 }
 0x8ec   :  { %1052 = vmatpush.bf16.xpose.msra.mxu1 %v1043_v61  ;;  %v1816_v61 = vld [vmem:[%s2637_s12 + $0x8] sm:$0xf0] }
 0x8f3   :  { %1790 = vmatmul.msk.bf16.vlgmr.msra.gmra.mxu1 %vm276_vm8, %v1037_v9 }
 0x8f4   :  { %1215 = vmatpush.bf16.msrb.mxu1 %v1809_v46 }
 0x8f8   :  { %1216 = vmatpush.bf16.msrb.mxu1 %v1801_v30 }
 0x970   :  { %v1054_v32 = vpop.f32.mrf.mxu1 }
 0x971   :  { %v1055_v3 = vadd.f32 %v1054_v32, %v2278_v40 }
 0x973   :  { %v1059_v1 = vsel %vm297_vm9, %v1055_v3, -inf }
 0x974   :  { %1060 = vmax.xlane.f32.xlu2 %v1059_v1 }
 0x978   :  { %v1056_v6 = vpop.f32.mrf.mxu1 }
 0x979   :  { %v1057_v7 = vadd.f32 %v1056_v6, %v2285_v44 }
 0x97b   :  { %v1062_v33 = vsel %vm297_vm9, %v1057_v7, -inf }
 0x97c   :  { %1063 = vmax.xlane.f32.xlu0 %v1062_v33 }
 0x9e7   :  { %v1061_v62 = vpop.xlane.xlu2 %1060 }
 0x9e8   :  { %v1065_v63 = vsub.f32 %v1055_v3, %v1061_v62  ;;  %v1819_v3 = vor.u32 %v1942_v60, %v1816_v61 }
 0x9ea   :  { %v1067_v4 = vmul.f32 1.442695, %v1065_v63 }
 0x9ec   :  { %1998 = vpow2.f32 %v1067_v4 }
 0x9ef   :  { %v1064_v10 = vpop.xlane.xlu0 %1063 }
 0x9f0   :  { %v1066_v5 = vsub.f32 %v1057_v7, %v1064_v10 }
 0x9f2   :  { %v1999_v8 = vpop.eup %1998  ;;  %v1069_v9 = vmul.f32 1.442695, %v1066_v5 }
 0x9f3   :  { %v1071_v11 = vsel %vm297_vm9, %v1999_v8, 0.0 }
 0x9f4   :  { %2000 = vpow2.f32 %v1069_v9  ;;  %1072 = vadd.xlane.f32.xlu1 %v1071_v11 }
 0x9fa   :  { %v2001_v40 = vpop.eup %2000 }
 0x9fb   :  { %v1074_v12 = vsel %vm297_vm9, %v2001_v40, 0.0 }
 0x9fc   :  { %1075 = vadd.xlane.f32.xlu2 %v1074_v12 }
 0xa67   :  { %v1073_v44 = vpop.xlane.xlu1 %1072 }
 0xa68   :  { %2002 = vrcp.f32 %v1073_v44 }
 0xa6e   :  { %v2003_v14 = vpop.eup %2002 }
 0xa6f   :  { %v1076_v13 = vpop.xlane.xlu2 %1075  ;;  %v1079_v17 = vmul.f32 %v2003_v14, %v1999_v8 }
 0xa70   :  { %2004 = vrcp.f32 %v1076_v13 }
 0xa76   :  { %v2005_v16 = vpop.eup %2004 }
 0xa77   :  { %v1080_v18 = vmul.f32 %v2005_v16, %v2001_v40 }
 0xa79   :  { %v1081_v19 = vpack.c.bf16 %v1080_v18, %v1079_v17 }
 0xa7b   :  { %1791 = vmatmul.msk.bf16.vlgmr.msra.gmra.mxu2 %vm297_vm9, %v1081_v19 }
 0xafe   :  { %v1095_v22 = vpop.f32.mrf.mxu2 }
 0xb06   :  { %v1097_v23 = vpop.f32.mrf.mxu2 }
 0xb07   :  { %v1100_v24 = vpack.c.bf16 %v1097_v23, %v1095_v22  ;;  %v1961_v22 = vld [vmem:[%s2636_s11 + $0x78] sm:$0xff]  ;;  %v1952_v23 = vld [vmem:[%s2636_s11 + $0x30] sm:$0xff] }
 0xb08   :  { %1503 = vmatpush.bf16.msra.mxu1 %v1961_v22 }
 0xb09   :  { %1793 = vmatmul.msk.bf16.vlgmr.msra.gmra.mxu3 %vm276_vm8, %v1100_v24  ;;  %v1960_v24 = vld [vmem:[%s2636_s11 + $0x70] sm:$0xff] }
 0xb0c   :  { %1504 = vmatpush.bf16.msra.mxu1 %v1960_v24 }
 0xb8c   :  { %v1118_v25 = vpop.f32.mrf.mxu3 }
 0xb8d   :  { %v1123_v26 = vadd.f32 %v1118_v25, %v868_v48  ;;  %v1944_v48 = vld [vmem:[%s2637_s12 + $0x14] sm:$0xf]  ;;  %v1951_v25 = vld [vmem:[%s2636_s11 + $0x28] sm:$0xff] }
 0xb8e   :  { %v1827_v50 = vor.u32 %v1944_v48, %v1824_v49 }
 0xb8f   :  { %v2472_v27 = vadd.f32 %v1123_v26, %v2139_v0  ;;  %v1804_v0 = vld [vmem:[%s2635_s10 + $0x10] sm:$0xf]  ;;  %v1959_v26 = vld [vmem:[%s2636_s11 + $0x68] sm:$0xff] }
 0xb90   :  { %1267 = vmatpush.bf16.msrb.mxu3 %v1827_v50  ;;  %1505 = vmatpush.bf16.msra.mxu1 %v1959_v26 }
 0xb91   :  { %v1128_v28 = vmul.f32 %v2472_v27, %v2472_v27 }
 0xb93   :  { %v1130_v29 = vsel %vm63_vm0, %v1128_v28, 0.0  ;;  %v1950_v28 = vld [vmem:[%s2636_s11 + $0x20] sm:$0xff] }
 0xb94   :  { %v1120_v37 = vpop.f32.mrf.mxu3  ;;  %1131 = vadd.xlane.f32.xlu0 %v1130_v29  ;;  %1268 = vmatpush.bf16.msrb.mxu3 %v1819_v3  ;;  %v1958_v29 = vld [vmem:[%s2636_s11 + $0x60] sm:$0xff] }
 0xb95   :  { %v1124_v34 = vadd.f32 %v1120_v37, %v869_v52  ;;  %1506 = vmatpush.bf16.msra.mxu1 %v1958_v29  ;;  %v1949_v37 = vld [vmem:[%s2636_s11 + $0x18] sm:$0xff] }
 0xb97   :  { %v2478_v35 = vadd.f32 %v1124_v34, %v2146_v2  ;;  %v1805_v2 = vor.u32 %v1941_v39, %v1804_v0  ;;  %v1957_v34 = vld [vmem:[%s2636_s11 + $0x58] sm:$0xff] }
 0xb99   :  { %v1129_v36 = vmul.f32 %v2478_v35, %v2478_v35  ;;  %1201 = vmatpush.bf16.msrb.mxu0 %v1805_v2  ;;  %1507 = vmatpush.bf16.msra.mxu1 %v1957_v34  ;;  %v1956_v2 = vld [vmem:[%s2636_s11 + $0x50] sm:$0xff]  ;;  %s2053_s11 = smov [#allocation2]  }
 0xb9a   :  { %s1525_s1 = sshll.u32 %s2053_s11, 4  ;;  %s1526_s1 = int_to_ptr.vmem [resolvable:$true] %s1525_s1 }
 0xb9b   :  { %v1133_v38 = vsel %vm63_vm0, %v1129_v36, 0.0 }
 0xb9c   :  { %1134 = vadd.xlane.f32.xlu1 %v1133_v38 }
 0xb9d   :  { %1202 = vmatpush.bf16.msrb.mxu0 %v1797_v57  ;;  %1508 = vmatpush.bf16.msra.mxu1 %v1956_v2 }
 0xba1   :  { %1489 = vmatpush.bf16.msra.mxu0 %v1953_v21  ;;  %1509 = vmatpush.bf16.msra.mxu1 %v1955_v43 }
 0xba5   :  { %1490 = vmatpush.bf16.msra.mxu0 %v1952_v23  ;;  %1510 = vmatpush.bf16.msra.mxu1 %v1954_v54 }
 0xba9   :  { %1491 = vmatpush.bf16.msra.mxu0 %v1951_v25 }
 0xbad   :  { %1492 = vmatpush.bf16.msra.mxu0 %v1950_v28 }
 0xbb1   :  { %1493 = vmatpush.bf16.msra.mxu0 %v1949_v37 }
 0xbb5   :  { %1494 = vmatpush.bf16.msra.mxu0 %v1948_v41 }
 0xbb9   :  { %1495 = vmatpush.bf16.msra.mxu0 %v1947_v42 }
 0xbbd   :  { %1496 = vmatpush.bf16.msra.mxu0 %v1946_v53 }
 0xc07   :  { %v1132_v52 = vpop.xlane.xlu0 %1131 }
 0xc08   :  { %v1136_v56 = vmul.f32 %v1132_v52, %v2161_v15 }
 0xc0a   :  { %v1138_v32 = vadd.f32 1e-06, %v1136_v56 }
 0xc0c   :  { %2006 = vrsqrt.f32 %v1138_v32  ;;  %vm1146_vm12 = vweird.f32 %v1138_v32 }
 0xc0f   :  { %v1135_v1 = vpop.xlane.xlu1 %1134 }
 0xc10   :  { %v1137_v6 = vmul.f32 %v1135_v1, %v2161_v15  ;;  %v1967_v15 = vld [vmem:[%s2639_s14] ss:$0 sm:$0xff] }
 0xc12   :  { %v2007_v7 = vpop.eup %2006  ;;  %v1139_v33 = vadd.f32 1e-06, %v1137_v6 }
 0xc13   :  { %v1141_v62 = vmul.f32 %v2007_v7, %v1138_v32  ;;  %vm1147_vm11 = vweird.f32 %v2007_v7 }
 0xc14   :  { %2008 = vrsqrt.f32 %v1139_v33  ;;  %vm1148_vm13 = vmor %vm1146_vm12, %vm1147_vm11  ;;  %vm1156_vm15 = vweird.f32 %v1139_v33 }
 0xc15   :  { %v1142_v63 = vmul.f32 %v2007_v7, %v1141_v62 }
 0xc17   :  { %v1143_v4 = vmul.f32 0.5, %v1142_v63 }
 0xc19   :  { %v1144_v10 = vsub.f32 1.5, %v1143_v4 }
 0xc1a   :  { %v2009_v5 = vpop.eup %2008 }
 0xc1b   :  { %v1151_v8 = vmul.f32 %v2009_v5, %v1139_v33  ;;  %v1145_v9 = vmul.f32 %v2007_v7, %v1144_v10  ;;  %vm1157_vm14 = vweird.f32 %v2009_v5 }
 0xc1c   :  { %vm1158_vm1 = vmor %vm1156_vm15, %vm1157_vm14 }
 0xc1d   :  { %v1152_v11 = vmul.f32 %v2009_v5, %v1151_v8  ;;  %v1149_v12 = vsel %vm1148_vm13, %v2007_v7, %v1145_v9 }
 0xc1e   :  { %v1160_v14 = vmul.f32 %v1149_v12, %v2472_v27 }
 0xc1f   :  { %v1153_v40 = vmul.f32 0.5, %v1152_v11 }
 0xc20   :  { %v1165_v18 = vmul.f32 %v1967_v15, %v1160_v14 }
 0xc21   :  { %v1154_v44 = vsub.f32 1.5, %v1153_v40 }
 0xc23   :  { %v1155_v13 = vmul.f32 %v2009_v5, %v1154_v44 }
 0xc25   :  { %v1159_v16 = vsel %vm1158_vm1, %v2009_v5, %v1155_v13 }
 0xc26   :  { %v1161_v17 = vmul.f32 %v1159_v16, %v2478_v35 }
 0xc28   :  { %v1166_v19 = vmul.f32 %v1967_v15, %v1161_v17 }
 0xc2a   :  { %v1167_v20 = vpack.c.bf16 %v1166_v19, %v1165_v18 }
 0xc2c   :  { %1810 = vmatmul.msk.bf16.vlgmr.msrb.gmra.mxu0 %vm63_vm0, %v1167_v20  ;;  %1811 = vmatmul.msk.bf16.vlgmr.msrb.gmra.mxu1 %vm63_vm0, %v1167_v20 }
 0xc2d   :  { %1828 = vmatmul.msk.bf16.vlgmr.msrb.gmra.mxu2 %vm63_vm0, %v1167_v20  ;;  %1829 = vmatmul.msk.bf16.vlgmr.msrb.gmra.mxu3 %vm63_vm0, %v1167_v20 }
 0xca9   :  { %v2572_v36 = vpop.f32.mrf.mxu0  ;;  %v2574_v38 = vpop.f32.mrf.mxu1 }
 0xcaa   :  { %v1830_v0 = vmul.f32 -1.442695, %v2572_v36  ;;  %v1831_v39 = vmul.f32 -1.442695, %v2574_v38 }
 0xcac   :  { %2010 = vpow2.f32 %v1830_v0 }
 0xcad   :  { %2012 = vpow2.f32 %v1831_v39 }
 0xcb0   :  { %v1256_v8 = vpop.f32.mrf.mxu2  ;;  %v1270_v16 = vpop.f32.mrf.mxu3 }
 0xcb1   :  { %v2590_v45 = vpop.f32.mrf.mxu0  ;;  %v2592_v46 = vpop.f32.mrf.mxu1 }
 0xcb2   :  { %v2011_v47 = vpop.eup %2010  ;;  %v1832_v48 = vmul.f32 -1.442695, %v2590_v45  ;;  %v1833_v52 = vmul.f32 -1.442695, %v2592_v46 }
 0xcb3   :  { %v2013_v49 = vpop.eup %2012  ;;  %v1287_v50 = vadd.f32 1.0, %v2011_v47 }
 0xcb4   :  { %v1288_v55 = vadd.f32 1.0, %v2013_v49  ;;  %2014 = vpow2.f32 %v1832_v48 }
 0xcb5   :  { %2016 = vrcp.f32 %v1287_v50  ;;  %v1302_v33 = vand.u32 2147483648, %v1287_v50  ;;  %vm1296_vm3 = vweird.f32 %v1287_v50  ;;  %v1300_v62 = vand.u32 2147483647, %v1287_v50 }
 0xcb6   :  { %2018 = vrcp.f32 %v1288_v55  ;;  %v1315_v5 = vand.u32 2147483647, %v1288_v55  ;;  %v1317_v40 = vand.u32 2147483648, %v1288_v55  ;;  %vm1311_vm6 = vweird.f32 %v1288_v55 }
 0xcb7   :  { %2020 = vpow2.f32 %v1833_v52  ;;  %v1303_v44 = vor.u32 1.1754944e-38, %v1302_v33  ;;  %vm1301_vm7 = vcmp.eq.f32.partialorder %v1300_v62, 8.507059e+37 }
 0xcb8   :  { %vm1316_vm10 = vcmp.eq.f32.partialorder %v1315_v5, 8.507059e+37  ;;  %v1318_v22 = vor.u32 1.1754944e-38, %v1317_v40  ;;  %v1258_v47 = vpop.f32.mrf.mxu2  ;;  %v1272_v53 = vpop.f32.mrf.mxu3 }
 0xcba   :  { %v2015_v56 = vpop.eup %2014 }
 0xcbb   :  { %v2017_v57 = vpop.eup %2016  ;;  %v1289_v58 = vadd.f32 1.0, %v2015_v56 }
 0xcbc   :  { %v2019_v51 = vpop.eup %2018  ;;  %v1292_v59 = vmul.f32 %v2017_v57, %v1287_v50  ;;  %vm1297_vm2 = vweird.f32 %v2017_v57 }
 0xcbd   :  { %v2021_v30 = vpop.eup %2020  ;;  %v1307_v31 = vmul.f32 %v2019_v51, %v1288_v55  ;;  %2022 = vrcp.f32 %v1289_v58  ;;  %vm2602_vm4 = vmor %vm1296_vm3, %vm1297_vm2  ;;  %vm1312_vm5 = vweird.f32 %v2019_v51  ;;  %v1332_v13 = vand.u32 2147483648, %v1289_v58 }
 0xcbe   :  { %v1293_v60 = vsub.f32 1.0, %v1292_v59  ;;  %v1290_v61 = vadd.f32 1.0, %v2021_v30  ;;  %vm2608_vm8 = vmor %vm1311_vm6, %vm1312_vm5  ;;  %v1330_v18 = vand.u32 2147483647, %v1289_v58  ;;  %vm1326_vm11 = vweird.f32 %v1289_v58 }
 0xcbf   :  { %v1308_v32 = vsub.f32 1.0, %v1307_v31  ;;  %v1333_v25 = vor.u32 1.1754944e-38, %v1332_v13 }
 0xcc0   :  { %v1294_v3 = vmul.f32 %v2017_v57, %v1293_v60  ;;  %2024 = vrcp.f32 %v1290_v61  ;;  %v1347_v24 = vand.u32 2147483648, %v1290_v61  ;;  %v1345_v28 = vand.u32 2147483647, %v1290_v61 }
 0xcc1   :  { %v1309_v1 = vmul.f32 %v2019_v51, %v1308_v32  ;;  %vm1331_vm14 = vcmp.eq.f32.partialorder %v1330_v18, 8.507059e+37  ;;  %vm1341_vm15 = vweird.f32 %v1290_v61 }
 0xcc2   :  { %v1295_v6 = vadd.f32 %v2017_v57, %v1294_v3  ;;  %v1348_v2 = vor.u32 1.1754944e-38, %v1347_v24  ;;  %vm1346_vm2 = vcmp.eq.f32.partialorder %v1345_v28, 8.507059e+37 }
 0xcc3   :  { %v2023_v7 = vpop.eup %2022  ;;  %v1310_v10 = vadd.f32 %v2019_v51, %v1309_v1 }
 0xcc4   :  { %v1322_v63 = vmul.f32 %v2023_v7, %v1289_v58  ;;  %v1299_v11 = vsel %vm2602_vm4, %v2017_v57, %v1295_v6  ;;  %vm1327_vm9 = vweird.f32 %v2023_v7 }
 0xcc5   :  { %v1304_v19 = vsel %vm1301_vm7, %v1303_v44, %v1299_v11  ;;  %v1314_v20 = vsel %vm2608_vm8, %v2019_v51, %v1310_v10  ;;  %vm1328_vm12 = vmor %vm1326_vm11, %vm1327_vm9 }
 0xcc6   :  { %v2025_v9 = vpop.eup %2024  ;;  %v1323_v12 = vsub.f32 1.0, %v1322_v63  ;;  %v1351_v29 = vmul.f32 %v1304_v19, %v2572_v36  ;;  %v1319_v37 = vsel %vm1316_vm10, %v1318_v22, %v1314_v20 }
 0xcc7   :  { %v1337_v15 = vmul.f32 %v2025_v9, %v1290_v61  ;;  %vm1342_vm13 = vweird.f32 %v2025_v9  ;;  %v1352_v42 = vmul.f32 %v1319_v37, %v2574_v38 }
 0xcc8   :  { %v1324_v17 = vmul.f32 %v2023_v7, %v1323_v12  ;;  %vm1343_vm1 = vmor %vm1341_vm15, %vm1342_vm13  ;;  %v1355_v48 = vmul.f32 %v1351_v29, %v1256_v8 }
 0xcc9   :  { %v1338_v21 = vsub.f32 1.0, %v1337_v15  ;;  %v1356_v54 = vmul.f32 %v1352_v42, %v1270_v16 }
 0xcca   :  { %v1325_v23 = vadd.f32 %v2023_v7, %v1324_v17 }
 0xccb   :  { %v1339_v26 = vmul.f32 %v2025_v9, %v1338_v21 }
 0xccc   :  { %v1329_v34 = vsel %vm1328_vm12, %v2023_v7, %v1325_v23 }
 0xccd   :  { %v1334_v0 = vsel %vm1331_vm14, %v1333_v25, %v1329_v34  ;;  %v1340_v39 = vadd.f32 %v2025_v9, %v1339_v26 }
 0xcce   :  { %v1353_v41 = vmul.f32 %v1334_v0, %v2590_v45 }
 0xccf   :  { %v1344_v43 = vsel %vm1343_vm1, %v2025_v9, %v1340_v39 }
 0xcd0   :  { %v1349_v49 = vsel %vm1346_vm2, %v1348_v2, %v1344_v43  ;;  %v1357_v50 = vmul.f32 %v1353_v41, %v1258_v47 }
 0xcd1   :  { %v1354_v36 = vmul.f32 %v1349_v49, %v2592_v46 }
 0xcd2   :  { %v1359_v52 = vpack.c.bf16 %v1357_v50, %v1355_v48 }
 0xcd3   :  { %v1358_v55 = vmul.f32 %v1354_v36, %v1272_v53 }
 0xcd4   :  { %1497 = vmatmul.bf16.vlgmr.msra.gmra.mxu0 %v1359_v52 }
 0xcd5   :  { %v1360_v56 = vpack.c.bf16 %v1358_v55, %v1356_v54 }
 0xcd7   :  { %1511 = vmatmul.bf16.vlgmr.msra.gmra.mxu1 %v1360_v56 }
 0xd51   :  { %v1498_v45 = vpop.f32.mrf.mxu0 }
 0xd54   :  { %v1512_v57 = vpop.f32.mrf.mxu1 }
 0xd55   :  { %v1513_v58 = vadd.f32 %v1512_v57, %v1498_v45 }
 0xd57   :  { %v1517_v38 = vadd.f32 %v1513_v58, %v2472_v27 }
 0xd59   :  { %1519 = vst.msk [vmem:[#allocation2] sm:$0xff] %vm63_vm0, %v1517_v38  ;;  %v1500_v51 = vpop.f32.mrf.mxu0 }
 0xd5c   :  { %v1514_v46 = vpop.f32.mrf.mxu1 }
 0xd5d   :  { %v1515_v59 = vadd.f32 %v1514_v46, %v1500_v51 }
 0xd5f   :  { %v1518_v30 = vadd.f32 %v1515_v59, %v2478_v35 }
 0xd61   :  { %1520 = vst.msk [vmem:[#allocation2 + $0x8] sm:$0xff] %vm63_vm0, %v1518_v30 }
 0xd62   :  { %1533 = dma.vmem_to_hbm [thread:$0]  %s1526_s1, 256, %s1528_s16, [#allocation3], %s2054_s17, %s2054_s17, %s2055_s13  }
 0xd63   :  { %2050 = dma.done.wait [#allocation3], 256  }
 0xd64   :  { %2051 = vsyncadd [#allocation3], 4294967040 }
 0xd65   :  { %1538 = vsyncpa [#allocation3], 1 }

</bundles_post_ra>
